<compile_context>
chip_gen: v6e
topology: v6e:2x2x1
jax: 0.10.0
libtpu: 0.0.40
codegen_flags: <defaults>
</compile_context>

<pallas_src>
import math
import functools

import jax
import jax.numpy as jnp
from jax import lax
from jax.experimental import pallas as pl
from jax.experimental.pallas import tpu as pltpu

# ----------------------------- configuration -------------------------------
D_MODEL = 32
NHEAD = 4
HEAD_DIM = D_MODEL // NHEAD
NEAR_KTH = 5
NEG_INF_MASK = -1.0e9


# ------------------------------- kernel ------------------------------------
def _nearby_attn_kernel(q_ref, k_ref, v_ref, sp_ref, tp_ref,
                        win_t_ref, bin_ref, wout_t_ref, bout_ref,
                        out_ref, attn_ref):
    # One grid step == one tile of BT batch elements.
    bt, n2, e = q_ref.shape
    n = k_ref.shape[1]

    q = q_ref[...]             # (BT, N2, E)
    k = k_ref[...]             # (BT, N,  E)
    v = v_ref[...]             # (BT, N,  E)
    sp = sp_ref[...]           # (BT, N,  3)
    tp = tp_ref[...]           # (BT, N2, 3)
    w_in_t = win_t_ref[...]    # (E, 3E)  == in_proj_weight.T
    b_in = bin_ref[...]        # (1, 3E)
    w_out_t = wout_t_ref[...]  # (E, E)   == out_proj.weight.T
    b_out = bout_ref[...]      # (1, E)

    # ---- squared distances via matmul expansion ----------------------------
    # ||t - s||^2 = ||t||^2 + ||s||^2 - 2 t.s  (no (N2, N, 3) intermediate)
    tp_sq = jnp.sum(tp * tp, axis=-1, keepdims=True)             # (BT, N2, 1)
    sp_sq = jnp.sum(sp * sp, axis=-1)[:, None, :]                 # (BT, 1,  N)
    cross = jnp.einsum('bqd,bkd->bqk', tp, sp,
                       preferred_element_type=jnp.float32)        # (BT, N2, N)
    dist = tp_sq + sp_sq - 2.0 * cross

    # ---- nearest-k additive mask -------------------------------------------
    col = lax.broadcasted_iota(jnp.int32, (bt, n2, n), 2)
    mask = jnp.full((bt, n2, n), NEG_INF_MASK, dtype=jnp.float32)
    d = dist
    for _ in range(NEAR_KTH):
        m = jnp.min(d, axis=-1, keepdims=True)
        is_min = d == m
        first = jnp.min(jnp.where(is_min, col, n), axis=-1, keepdims=True)
        onehot = col == first
        mask = jnp.where(onehot, 0.0, mask)
        d = jnp.where(onehot, jnp.inf, d)

    # ---- QKV in-projection: one MXU matmul on the stacked inputs -----------
    rows_q = bt * n2
    rows_kv = bt * n
    stacked = jnp.concatenate(
        [q.reshape(rows_q, e), k.reshape(rows_kv, e), v.reshape(rows_kv, e)],
        axis=0)                                                   # (BT*(N2+2N), E)
    proj = jnp.dot(stacked, w_in_t,
                   preferred_element_type=jnp.float32) + b_in     # (rows, 3E)

    scale = 1.0 / math.sqrt(HEAD_DIM)
    qp = (proj[0:rows_q, 0:e] * scale).reshape(bt, n2, e)
    kp = proj[rows_q:rows_q + rows_kv, e:2 * e].reshape(bt, n, e)
    vp = proj[rows_q + rows_kv:rows_q + 2 * rows_kv, 2 * e:3 * e].reshape(bt, n, e)

    # ---- per-head attention (batched over the batch-tile) ------------------
    attn_sum = jnp.zeros((bt, n2, n), dtype=jnp.float32)
    ctx_heads = []
    for h in range(NHEAD):
        sl = slice(h * HEAD_DIM, (h + 1) * HEAD_DIM)
        s = jnp.einsum('bqd,bkd->bqk', qp[:, :, sl], kp[:, :, sl],
                       preferred_element_type=jnp.float32)        # (BT, N2, N)
        s = s + mask
        s = s - jnp.max(s, axis=-1, keepdims=True)
        p = jnp.exp(s)
        # exact reciprocal: the head-averaged attn weights are a checked output
        p = p * pl.reciprocal(jnp.sum(p, axis=-1, keepdims=True), approx=False)
        attn_sum = attn_sum + p
        ctx_heads.append(jnp.einsum('bqk,bkd->bqd', p, vp[:, :, sl],
                                    preferred_element_type=jnp.float32))
    ctx = jnp.concatenate(ctx_heads, axis=-1)                     # (BT, N2, E)

    # ---- single output projection after the head loop ----------------------
    out2 = jnp.dot(ctx.reshape(rows_q, e), w_out_t,
                   preferred_element_type=jnp.float32) + b_out    # (BT*N2, E)

    out_ref[...] = out2
    attn_ref[...] = (attn_sum * (1.0 / NHEAD)).reshape(rows_q, n)


# ------------------------------- wrapper ------------------------------------
@functools.partial(jax.jit, static_argnames=("batch_tile",))
def multihead_positional_attention_nearby(query, key, value,
                                          src_position, tgt_position,
                                          in_proj_weight, in_proj_bias,
                                          out_proj_weight, out_proj_bias,
                                          *, batch_tile=None):
    """query/key/value: [L, B, E]; positions: [L, B, 3] (seq-first, PyTorch layout)."""
    n2, b, e = query.shape
    n = key.shape[0]

    # Batch tiling: keep >=2 programs when B >= 2 (megacore) while packing whole
    # batch tiles per program to amortize per-step overhead for larger B.
    if batch_tile is None:
        num_tiles = 2 if b >= 2 else 1
        bt = -(-b // num_tiles)          # cdiv
    else:
        bt = int(batch_tile)
        num_tiles = -(-b // bt)
    b_pad = bt * num_tiles

    def to_batch_major(x):
        return jnp.transpose(x, (1, 0, 2)).astype(jnp.float32)

    qb = to_batch_major(query)          # (B, N2, E)
    kb = to_batch_major(key)            # (B, N,  E)
    vb = to_batch_major(value)          # (B, N,  E)
    spb = to_batch_major(src_position)  # (B, N,  3)
    tpb = to_batch_major(tgt_position)  # (B, N2, 3)

    if b_pad != b:
        pad = ((0, b_pad - b), (0, 0), (0, 0))
        qb = jnp.pad(qb, pad)
        kb = jnp.pad(kb, pad)
        vb = jnp.pad(vb, pad)
        spb = jnp.pad(spb, pad)
        tpb = jnp.pad(tpb, pad)

    w_in_t = jnp.transpose(in_proj_weight).astype(jnp.float32)    # (E, 3E)
    b_in = in_proj_bias.reshape(1, 3 * e).astype(jnp.float32)     # (1, 3E)
    w_out_t = jnp.transpose(out_proj_weight).astype(jnp.float32)  # (E, E)
    b_out = out_proj_bias.reshape(1, e).astype(jnp.float32)       # (1, E)

    out_flat, attn_flat = pl.pallas_call(
        _nearby_attn_kernel,
        out_shape=(jax.ShapeDtypeStruct((b_pad * n2, e), jnp.float32),
                   jax.ShapeDtypeStruct((b_pad * n2, n), jnp.float32)),
        grid=(num_tiles,),
        in_specs=[
            pl.BlockSpec((bt, n2, e), lambda i: (i, 0, 0)),   # q
            pl.BlockSpec((bt, n, e), lambda i: (i, 0, 0)),    # k
            pl.BlockSpec((bt, n, e), lambda i: (i, 0, 0)),    # v
            pl.BlockSpec((bt, n, 3), lambda i: (i, 0, 0)),    # src_position
            pl.BlockSpec((bt, n2, 3), lambda i: (i, 0, 0)),   # tgt_position
            pl.BlockSpec((e, 3 * e), lambda i: (0, 0)),       # in_proj_weight.T
            pl.BlockSpec((1, 3 * e), lambda i: (0, 0)),       # in_proj_bias
            pl.BlockSpec((e, e), lambda i: (0, 0)),           # out_proj.weight.T
            pl.BlockSpec((1, e), lambda i: (0, 0)),           # out_proj.bias
        ],
        out_specs=(
            pl.BlockSpec((bt * n2, e), lambda i: (i, 0)),     # attn output (flat rows)
            pl.BlockSpec((bt * n2, n), lambda i: (i, 0)),     # head-avg weights (flat)
        ),
        compiler_params=pltpu.CompilerParams(
            dimension_semantics=("parallel",)),
    )(qb, kb, vb, spb, tpb, w_in_t, b_in, w_out_t, b_out)

    out_b = out_flat.reshape(b_pad, n2, e)[:b]        # (B, N2, E)
    attn = attn_flat.reshape(b_pad, n2, n)[:b]        # (B, N2, N)
    src2 = jnp.transpose(out_b, (1, 0, 2))            # (N2, B, E), like torch.cat(dim=1)
    return src2, attn


# ---------------------------- pure-JAX reference -----------------------------
def _reference(query, key, value, src_position, tgt_position,
               w_in, b_in, w_out, b_out):
    n2, bsz, e = query.shape
    n = key.shape[0]
    hd = HEAD_DIM

    qb = jnp.transpose(query, (1, 0, 2))
    kb = jnp.transpose(key, (1, 0, 2))
    vb = jnp.transpose(value, (1, 0, 2))
    spb = jnp.transpose(src_position, (1, 0, 2))
    tpb = jnp.transpose(tgt_position, (1, 0, 2))

    dist = jnp.sum((tpb[:, :, None, :] - spb[:, None, :, :]) ** 2, axis=-1)  # (B,N2,N)
    col = jnp.arange(n, dtype=jnp.int32)[None, None, :]
    mask = jnp.full(dist.shape, NEG_INF_MASK, dtype=jnp.float32)
    d = dist
    for _ in range(NEAR_KTH):
        m = jnp.min(d, axis=-1, keepdims=True)
        first = jnp.min(jnp.where(d == m, col, n), axis=-1, keepdims=True)
        onehot = col == first
        mask = jnp.where(onehot, 0.0, mask)
        d = jnp.where(onehot, jnp.inf, d)

    wq, wk, wv = w_in[:e], w_in[e:2 * e], w_in[2 * e:]
    bq, bk, bv = b_in[:e], b_in[e:2 * e], b_in[2 * e:]
    qp = (qb @ wq.T + bq) * (1.0 / math.sqrt(hd))
    kp = kb @ wk.T + bk
    vp = vb @ wv.T + bv
    qh = qp.reshape(bsz, n2, NHEAD, hd)
    kh = kp.reshape(bsz, n, NHEAD, hd)
    vh = vp.reshape(bsz, n, NHEAD, hd)
    s = jnp.einsum('bqhd,bkhd->bhqk', qh, kh) + mask[:, None]
    p = jax.nn.softmax(s, axis=-1)
    oh = jnp.einsum('bhqk,bkhd->bqhd', p, vh).reshape(bsz, n2, e)
    out = oh @ w_out.T + b_out
    return jnp.transpose(out, (1, 0, 2)), jnp.mean(p, axis=1)


# --------------------------------- main --------------------------------------
if __name__ == "__main__":
    N = 16     # source sequence length
    N2 = 16    # target sequence length
    B = 2
    E = D_MODEL

    key0 = jax.random.PRNGKey(0)
    ks = jax.random.split(key0, 10)
    query = jax.random.normal(ks[0], (N2, B, E), jnp.float32)
    keyx = jax.random.normal(ks[1], (N, B, E), jnp.float32)
    value = jax.random.normal(ks[2], (N, B, E), jnp.float32)
    src_position = jax.random.normal(ks[3], (N, B, 3), jnp.float32)
    tgt_position = jax.random.normal(ks[4], (N2, B, 3), jnp.float32)

    # deterministic synthetic parameters (nn.MultiheadAttention shapes)
    in_proj_weight = 0.1 * jax.random.normal(ks[5], (3 * E, E), jnp.float32)
    in_proj_bias = 0.01 * jax.random.normal(ks[6], (3 * E,), jnp.float32)
    out_proj_weight = 0.1 * jax.random.normal(ks[7], (E, E), jnp.float32)
    out_proj_bias = 0.01 * jax.random.normal(ks[8], (E,), jnp.float32)

    src2, attn = multihead_positional_attention_nearby(
        query, keyx, value, src_position, tgt_position,
        in_proj_weight, in_proj_bias, out_proj_weight, out_proj_bias)
    jax.block_until_ready((src2, attn))

    ref_src2, ref_attn = _reference(
        query, keyx, value, src_position, tgt_position,
        in_proj_weight, in_proj_bias, out_proj_weight, out_proj_bias)

    assert src2.shape == (N2, B, E) and attn.shape == (B, N2, N)
    assert jnp.allclose(src2, ref_src2, rtol=1e-4, atol=1e-4)
    assert jnp.allclose(attn, ref_attn, rtol=1e-4, atol=1e-4)

    print("KERNEL_OK")
</pallas_src>

<mosaic_0001>
module attributes {stable_mosaic.version = 11 : i64} {
  func.func @_nearby_attn_kernel(%arg0: i32, %arg1: memref<1x16x32xf32, #tpu.memory_space<vmem>>, %arg2: memref<1x16x32xf32, #tpu.memory_space<vmem>>, %arg3: memref<1x16x32xf32, #tpu.memory_space<vmem>>, %arg4: memref<1x16x3xf32, #tpu.memory_space<vmem>>, %arg5: memref<1x16x3xf32, #tpu.memory_space<vmem>>, %arg6: memref<32x96xf32, #tpu.memory_space<vmem>>, %arg7: memref<1x96xf32, #tpu.memory_space<vmem>>, %arg8: memref<32x32xf32, #tpu.memory_space<vmem>>, %arg9: memref<1x32xf32, #tpu.memory_space<vmem>>, %arg10: memref<16x32xf32, #tpu.memory_space<vmem>>, %arg11: memref<16x16xf32, #tpu.memory_space<vmem>>) attributes {dimension_semantics = [#tpu.dimension_semantics<parallel>], iteration_bounds = array<i64: 2>, scalar_prefetch = 0 : i64, scratch_operands = 0 : i64, tpu.core_type = #tpu.core_type<tc>, window_params = [{transform_indices = @transform_0, window_bounds = array<i64: 1, 16, 32>}, {transform_indices = @transform_1, window_bounds = array<i64: 1, 16, 32>}, {transform_indices = @transform_2, window_bounds = array<i64: 1, 16, 32>}, {transform_indices = @transform_3, window_bounds = array<i64: 1, 16, 3>}, {transform_indices = @transform_4, window_bounds = array<i64: 1, 16, 3>}, {pipeline_mode = #tpu.pipeline_mode<synchronous>, transform_indices = @transform_5, window_bounds = array<i64: 32, 96>}, {pipeline_mode = #tpu.pipeline_mode<synchronous>, transform_indices = @transform_6, window_bounds = array<i64: 1, 96>}, {pipeline_mode = #tpu.pipeline_mode<synchronous>, transform_indices = @transform_7, window_bounds = array<i64: 32, 32>}, {pipeline_mode = #tpu.pipeline_mode<synchronous>, transform_indices = @transform_8, window_bounds = array<i64: 1, 32>}, {transform_indices = @transform_9, window_bounds = array<i64: 16, 32>}, {transform_indices = @transform_10, window_bounds = array<i64: 16, 16>}]} {
    %c0 = arith.constant 0 : index
    %c0_0 = arith.constant 0 : index
    %c0_1 = arith.constant 0 : index
    %0 = vector.load %arg1[%c0, %c0_0, %c0_1] : memref<1x16x32xf32, #tpu.memory_space<vmem>>, vector<1x16x32xf32>
    %c0_2 = arith.constant 0 : index
    %c0_3 = arith.constant 0 : index
    %c0_4 = arith.constant 0 : index
    %1 = vector.load %arg2[%c0_2, %c0_3, %c0_4] : memref<1x16x32xf32, #tpu.memory_space<vmem>>, vector<1x16x32xf32>
    %c0_5 = arith.constant 0 : index
    %c0_6 = arith.constant 0 : index
    %c0_7 = arith.constant 0 : index
    %2 = vector.load %arg3[%c0_5, %c0_6, %c0_7] : memref<1x16x32xf32, #tpu.memory_space<vmem>>, vector<1x16x32xf32>
    %c0_8 = arith.constant 0 : index
    %c0_9 = arith.constant 0 : index
    %c0_10 = arith.constant 0 : index
    %3 = vector.load %arg4[%c0_8, %c0_9, %c0_10] : memref<1x16x3xf32, #tpu.memory_space<vmem>>, vector<1x16x3xf32>
    %c0_11 = arith.constant 0 : index
    %c0_12 = arith.constant 0 : index
    %c0_13 = arith.constant 0 : index
    %4 = vector.load %arg5[%c0_11, %c0_12, %c0_13] : memref<1x16x3xf32, #tpu.memory_space<vmem>>, vector<1x16x3xf32>
    %c0_14 = arith.constant 0 : index
    %c0_15 = arith.constant 0 : index
    %5 = vector.load %arg6[%c0_14, %c0_15] : memref<32x96xf32, #tpu.memory_space<vmem>>, vector<32x96xf32>
    %c0_16 = arith.constant 0 : index
    %c0_17 = arith.constant 0 : index
    %6 = vector.load %arg7[%c0_16, %c0_17] : memref<1x96xf32, #tpu.memory_space<vmem>>, vector<1x96xf32>
    %c0_18 = arith.constant 0 : index
    %c0_19 = arith.constant 0 : index
    %7 = vector.load %arg8[%c0_18, %c0_19] : memref<32x32xf32, #tpu.memory_space<vmem>>, vector<32x32xf32>
    %c0_20 = arith.constant 0 : index
    %c0_21 = arith.constant 0 : index
    %8 = vector.load %arg9[%c0_20, %c0_21] : memref<1x32xf32, #tpu.memory_space<vmem>>, vector<1x32xf32>
    %9 = arith.mulf %4, %4 : vector<1x16x3xf32>
    %cst = arith.constant dense<0.000000e+00> : vector<1x16xf32>
    %10 = vector.multi_reduction <add>, %9, %cst [2] : vector<1x16x3xf32> to vector<1x16xf32>
    %11 = vector.shape_cast %10 : vector<1x16xf32> to vector<1x16x1xf32>
    %12 = arith.mulf %3, %3 : vector<1x16x3xf32>
    %cst_22 = arith.constant dense<0.000000e+00> : vector<1x16xf32>
    %13 = vector.multi_reduction <add>, %12, %cst_22 [2] : vector<1x16x3xf32> to vector<1x16xf32>
    %14 = vector.shape_cast %13 : vector<1x16xf32> to vector<1x1x16xf32>
    "tpu.trace_start"() <{level = 10 : i32, message = "bqd,bkd->bqk"}> : () -> ()
    %cst_23 = arith.constant dense<0.000000e+00> : vector<1x16x16xf32>
    %15 = tpu.matmul %4, %3, %cst_23 {dimension_numbers = #tpu.dot_dimension_numbers<[2], [2], [1], [1], [0, 0, 0, 1, 1, 1], [0], [0]>} : vector<1x16x3xf32>, vector<1x16x3xf32>, vector<1x16x16xf32> -> vector<1x16x16xf32>
    "tpu.trace_stop"() : () -> ()
    %16 = vector.broadcast %11 : vector<1x16x1xf32> to vector<1x16x16xf32>
    %17 = vector.broadcast %14 : vector<1x1x16xf32> to vector<1x16x16xf32>
    %18 = arith.addf %16, %17 : vector<1x16x16xf32>
    %cst_24 = arith.constant 2.000000e+00 : f32
    %19 = vector.broadcast %cst_24 : f32 to vector<1x16x16xf32>
    %20 = arith.mulf %19, %15 : vector<1x16x16xf32>
    %21 = arith.subf %18, %20 : vector<1x16x16xf32>
    %22 = tpu.iota {dimensions = array<i32: 2>} : vector<1x16x16xi32>
    %cst_25 = arith.constant -1.000000e+09 : f32
    %23 = vector.broadcast %cst_25 : f32 to vector<1x16x16xf32>
    %cst_26 = arith.constant dense<0x7F800000> : vector<1x16xf32>
    %24 = vector.multi_reduction <minimumf>, %21, %cst_26 [2] : vector<1x16x16xf32> to vector<1x16xf32>
    %25 = vector.shape_cast %24 : vector<1x16xf32> to vector<1x16x1xf32>
    %26 = vector.broadcast %25 : vector<1x16x1xf32> to vector<1x16x16xf32>
    %27 = arith.cmpf oeq, %21, %26 : vector<1x16x16xf32>
    %c16_i32 = arith.constant 16 : i32
    %28 = vector.broadcast %c16_i32 : i32 to vector<1x16x16xi32>
    %29 = arith.select %27, %22, %28 : vector<1x16x16xi1>, vector<1x16x16xi32>
    %cst_27 = arith.constant dense<2147483647> : vector<1x16xi32>
    %30 = vector.multi_reduction <minsi>, %29, %cst_27 [2] : vector<1x16x16xi32> to vector<1x16xi32>
    %31 = vector.shape_cast %30 : vector<1x16xi32> to vector<1x16x1xi32>
    %32 = vector.broadcast %31 : vector<1x16x1xi32> to vector<1x16x16xi32>
    %33 = arith.cmpi eq, %22, %32 : vector<1x16x16xi32>
    %cst_28 = arith.constant 0.000000e+00 : f32
    %34 = vector.broadcast %cst_28 : f32 to vector<1x16x16xf32>
    %35 = arith.select %33, %34, %23 : vector<1x16x16xi1>, vector<1x16x16xf32>
    %cst_29 = arith.constant 0x7F800000 : f32
    %36 = vector.broadcast %cst_29 : f32 to vector<1x16x16xf32>
    %37 = arith.select %33, %36, %21 : vector<1x16x16xi1>, vector<1x16x16xf32>
    %cst_30 = arith.constant dense<0x7F800000> : vector<1x16xf32>
    %38 = vector.multi_reduction <minimumf>, %37, %cst_30 [2] : vector<1x16x16xf32> to vector<1x16xf32>
    %39 = vector.shape_cast %38 : vector<1x16xf32> to vector<1x16x1xf32>
    %40 = vector.broadcast %39 : vector<1x16x1xf32> to vector<1x16x16xf32>
    %41 = arith.cmpf oeq, %37, %40 : vector<1x16x16xf32>
    %c16_i32_31 = arith.constant 16 : i32
    %42 = vector.broadcast %c16_i32_31 : i32 to vector<1x16x16xi32>
    %43 = arith.select %41, %22, %42 : vector<1x16x16xi1>, vector<1x16x16xi32>
    %cst_32 = arith.constant dense<2147483647> : vector<1x16xi32>
    %44 = vector.multi_reduction <minsi>, %43, %cst_32 [2] : vector<1x16x16xi32> to vector<1x16xi32>
    %45 = vector.shape_cast %44 : vector<1x16xi32> to vector<1x16x1xi32>
    %46 = vector.broadcast %45 : vector<1x16x1xi32> to vector<1x16x16xi32>
    %47 = arith.cmpi eq, %22, %46 : vector<1x16x16xi32>
    %cst_33 = arith.constant 0.000000e+00 : f32
    %48 = vector.broadcast %cst_33 : f32 to vector<1x16x16xf32>
    %49 = arith.select %47, %48, %35 : vector<1x16x16xi1>, vector<1x16x16xf32>
    %cst_34 = arith.constant 0x7F800000 : f32
    %50 = vector.broadcast %cst_34 : f32 to vector<1x16x16xf32>
    %51 = arith.select %47, %50, %37 : vector<1x16x16xi1>, vector<1x16x16xf32>
    %cst_35 = arith.constant dense<0x7F800000> : vector<1x16xf32>
    %52 = vector.multi_reduction <minimumf>, %51, %cst_35 [2] : vector<1x16x16xf32> to vector<1x16xf32>
    %53 = vector.shape_cast %52 : vector<1x16xf32> to vector<1x16x1xf32>
    %54 = vector.broadcast %53 : vector<1x16x1xf32> to vector<1x16x16xf32>
    %55 = arith.cmpf oeq, %51, %54 : vector<1x16x16xf32>
    %c16_i32_36 = arith.constant 16 : i32
    %56 = vector.broadcast %c16_i32_36 : i32 to vector<1x16x16xi32>
    %57 = arith.select %55, %22, %56 : vector<1x16x16xi1>, vector<1x16x16xi32>
    %cst_37 = arith.constant dense<2147483647> : vector<1x16xi32>
    %58 = vector.multi_reduction <minsi>, %57, %cst_37 [2] : vector<1x16x16xi32> to vector<1x16xi32>
    %59 = vector.shape_cast %58 : vector<1x16xi32> to vector<1x16x1xi32>
    %60 = vector.broadcast %59 : vector<1x16x1xi32> to vector<1x16x16xi32>
    %61 = arith.cmpi eq, %22, %60 : vector<1x16x16xi32>
    %cst_38 = arith.constant 0.000000e+00 : f32
    %62 = vector.broadcast %cst_38 : f32 to vector<1x16x16xf32>
    %63 = arith.select %61, %62, %49 : vector<1x16x16xi1>, vector<1x16x16xf32>
    %cst_39 = arith.constant 0x7F800000 : f32
    %64 = vector.broadcast %cst_39 : f32 to vector<1x16x16xf32>
    %65 = arith.select %61, %64, %51 : vector<1x16x16xi1>, vector<1x16x16xf32>
    %cst_40 = arith.constant dense<0x7F800000> : vector<1x16xf32>
    %66 = vector.multi_reduction <minimumf>, %65, %cst_40 [2] : vector<1x16x16xf32> to vector<1x16xf32>
    %67 = vector.shape_cast %66 : vector<1x16xf32> to vector<1x16x1xf32>
    %68 = vector.broadcast %67 : vector<1x16x1xf32> to vector<1x16x16xf32>
    %69 = arith.cmpf oeq, %65, %68 : vector<1x16x16xf32>
    %c16_i32_41 = arith.constant 16 : i32
    %70 = vector.broadcast %c16_i32_41 : i32 to vector<1x16x16xi32>
    %71 = arith.select %69, %22, %70 : vector<1x16x16xi1>, vector<1x16x16xi32>
    %cst_42 = arith.constant dense<2147483647> : vector<1x16xi32>
    %72 = vector.multi_reduction <minsi>, %71, %cst_42 [2] : vector<1x16x16xi32> to vector<1x16xi32>
    %73 = vector.shape_cast %72 : vector<1x16xi32> to vector<1x16x1xi32>
    %74 = vector.broadcast %73 : vector<1x16x1xi32> to vector<1x16x16xi32>
    %75 = arith.cmpi eq, %22, %74 : vector<1x16x16xi32>
    %cst_43 = arith.constant 0.000000e+00 : f32
    %76 = vector.broadcast %cst_43 : f32 to vector<1x16x16xf32>
    %77 = arith.select %75, %76, %63 : vector<1x16x16xi1>, vector<1x16x16xf32>
    %cst_44 = arith.constant 0x7F800000 : f32
    %78 = vector.broadcast %cst_44 : f32 to vector<1x16x16xf32>
    %79 = arith.select %75, %78, %65 : vector<1x16x16xi1>, vector<1x16x16xf32>
    %cst_45 = arith.constant dense<0x7F800000> : vector<1x16xf32>
    %80 = vector.multi_reduction <minimumf>, %79, %cst_45 [2] : vector<1x16x16xf32> to vector<1x16xf32>
    %81 = vector.shape_cast %80 : vector<1x16xf32> to vector<1x16x1xf32>
    %82 = vector.broadcast %81 : vector<1x16x1xf32> to vector<1x16x16xf32>
    %83 = arith.cmpf oeq, %79, %82 : vector<1x16x16xf32>
    %c16_i32_46 = arith.constant 16 : i32
    %84 = vector.broadcast %c16_i32_46 : i32 to vector<1x16x16xi32>
    %85 = arith.select %83, %22, %84 : vector<1x16x16xi1>, vector<1x16x16xi32>
    %cst_47 = arith.constant dense<2147483647> : vector<1x16xi32>
    %86 = vector.multi_reduction <minsi>, %85, %cst_47 [2] : vector<1x16x16xi32> to vector<1x16xi32>
    %87 = vector.shape_cast %86 : vector<1x16xi32> to vector<1x16x1xi32>
    %88 = vector.broadcast %87 : vector<1x16x1xi32> to vector<1x16x16xi32>
    %89 = arith.cmpi eq, %22, %88 : vector<1x16x16xi32>
    %cst_48 = arith.constant 0.000000e+00 : f32
    %90 = vector.broadcast %cst_48 : f32 to vector<1x16x16xf32>
    %91 = arith.select %89, %90, %77 : vector<1x16x16xi1>, vector<1x16x16xf32>
    %92 = vector.shape_cast %0 : vector<1x16x32xf32> to vector<16x32xf32>
    %93 = vector.shape_cast %1 : vector<1x16x32xf32> to vector<16x32xf32>
    %94 = vector.shape_cast %2 : vector<1x16x32xf32> to vector<16x32xf32>
    %95 = tpu.concatenate %92, %93, %94 in 0 : vector<16x32xf32>, vector<16x32xf32>, vector<16x32xf32> -> vector<48x32xf32>
    %cst_49 = arith.constant dense<0.000000e+00> : vector<48x96xf32>
    %96 = tpu.matmul %95, %5, %cst_49 {dimension_numbers = #tpu.dot_dimension_numbers<[1], [0], [0], [1], [0, 0, 1, 1], [], []>} : vector<48x32xf32>, vector<32x96xf32>, vector<48x96xf32> -> vector<48x96xf32>
    %97 = vector.broadcast %6 : vector<1x96xf32> to vector<48x96xf32>
    %98 = arith.addf %96, %97 : vector<48x96xf32>
    %99 = vector.extract_strided_slice %98 {offsets = [0, 0], sizes = [16, 32], strides = [1, 1]} : vector<48x96xf32> to vector<16x32xf32>
    %cst_50 = arith.constant 0.353553385 : f32
    %100 = vector.broadcast %cst_50 : f32 to vector<16x32xf32>
    %101 = arith.mulf %99, %100 : vector<16x32xf32>
    %102 = vector.shape_cast %101 : vector<16x32xf32> to vector<1x16x32xf32>
    %103 = vector.extract_strided_slice %98 {offsets = [16, 32], sizes = [16, 32], strides = [1, 1]} : vector<48x96xf32> to vector<16x32xf32>
    %104 = vector.shape_cast %103 : vector<16x32xf32> to vector<1x16x32xf32>
    %105 = vector.extract_strided_slice %98 {offsets = [32, 64], sizes = [16, 32], strides = [1, 1]} : vector<48x96xf32> to vector<16x32xf32>
    %106 = vector.shape_cast %105 : vector<16x32xf32> to vector<1x16x32xf32>
    %cst_51 = arith.constant 0.000000e+00 : f32
    %107 = vector.broadcast %cst_51 : f32 to vector<1x16x16xf32>
    %108 = vector.extract_strided_slice %102 {offsets = [0, 0, 0], sizes = [1, 16, 8], strides = [1, 1, 1]} : vector<1x16x32xf32> to vector<1x16x8xf32>
    %109 = vector.extract_strided_slice %104 {offsets = [0, 0, 0], sizes = [1, 16, 8], strides = [1, 1, 1]} : vector<1x16x32xf32> to vector<1x16x8xf32>
    "tpu.trace_start"() <{level = 10 : i32, message = "bqd,bkd->bqk"}> : () -> ()
    %cst_52 = arith.constant dense<0.000000e+00> : vector<1x16x16xf32>
    %110 = tpu.matmul %108, %109, %cst_52 {dimension_numbers = #tpu.dot_dimension_numbers<[2], [2], [1], [1], [0, 0, 0, 1, 1, 1], [0], [0]>} : vector<1x16x8xf32>, vector<1x16x8xf32>, vector<1x16x16xf32> -> vector<1x16x16xf32>
    "tpu.trace_stop"() : () -> ()
    %111 = arith.addf %110, %91 : vector<1x16x16xf32>
    %cst_53 = arith.constant dense<0xFF800000> : vector<1x16xf32>
    %112 = vector.multi_reduction <maximumf>, %111, %cst_53 [2] : vector<1x16x16xf32> to vector<1x16xf32>
    %113 = vector.shape_cast %112 : vector<1x16xf32> to vector<1x16x1xf32>
    %114 = vector.broadcast %113 : vector<1x16x1xf32> to vector<1x16x16xf32>
    %115 = arith.subf %111, %114 : vector<1x16x16xf32>
    %116 = math.exp %115 : vector<1x16x16xf32>
    %cst_54 = arith.constant dense<0.000000e+00> : vector<1x16xf32>
    %117 = vector.multi_reduction <add>, %116, %cst_54 [2] : vector<1x16x16xf32> to vector<1x16xf32>
    %118 = vector.shape_cast %117 : vector<1x16xf32> to vector<1x16x1xf32>
    %119 = tpu.reciprocal %118 : vector<1x16x1xf32> -> vector<1x16x1xf32>
    %120 = vector.broadcast %119 : vector<1x16x1xf32> to vector<1x16x16xf32>
    %121 = arith.mulf %116, %120 : vector<1x16x16xf32>
    %122 = arith.addf %107, %121 : vector<1x16x16xf32>
    %123 = vector.extract_strided_slice %106 {offsets = [0, 0, 0], sizes = [1, 16, 8], strides = [1, 1, 1]} : vector<1x16x32xf32> to vector<1x16x8xf32>
    "tpu.trace_start"() <{level = 10 : i32, message = "bqk,bkd->bqd"}> : () -> ()
    %cst_55 = arith.constant dense<0.000000e+00> : vector<1x16x8xf32>
    %124 = tpu.matmul %121, %123, %cst_55 {dimension_numbers = #tpu.dot_dimension_numbers<[2], [1], [1], [2], [0, 0, 0, 1, 1, 2], [0], [0]>} : vector<1x16x16xf32>, vector<1x16x8xf32>, vector<1x16x8xf32> -> vector<1x16x8xf32>
    "tpu.trace_stop"() : () -> ()
    %125 = vector.extract_strided_slice %102 {offsets = [0, 0, 8], sizes = [1, 16, 8], strides = [1, 1, 1]} : vector<1x16x32xf32> to vector<1x16x8xf32>
    %126 = vector.extract_strided_slice %104 {offsets = [0, 0, 8], sizes = [1, 16, 8], strides = [1, 1, 1]} : vector<1x16x32xf32> to vector<1x16x8xf32>
    "tpu.trace_start"() <{level = 10 : i32, message = "bqd,bkd->bqk"}> : () -> ()
    %cst_56 = arith.constant dense<0.000000e+00> : vector<1x16x16xf32>
    %127 = tpu.matmul %125, %126, %cst_56 {dimension_numbers = #tpu.dot_dimension_numbers<[2], [2], [1], [1], [0, 0, 0, 1, 1, 1], [0], [0]>} : vector<1x16x8xf32>, vector<1x16x8xf32>, vector<1x16x16xf32> -> vector<1x16x16xf32>
    "tpu.trace_stop"() : () -> ()
    %128 = arith.addf %127, %91 : vector<1x16x16xf32>
    %cst_57 = arith.constant dense<0xFF800000> : vector<1x16xf32>
    %129 = vector.multi_reduction <maximumf>, %128, %cst_57 [2] : vector<1x16x16xf32> to vector<1x16xf32>
    %130 = vector.shape_cast %129 : vector<1x16xf32> to vector<1x16x1xf32>
    %131 = vector.broadcast %130 : vector<1x16x1xf32> to vector<1x16x16xf32>
    %132 = arith.subf %128, %131 : vector<1x16x16xf32>
    %133 = math.exp %132 : vector<1x16x16xf32>
    %cst_58 = arith.constant dense<0.000000e+00> : vector<1x16xf32>
    %134 = vector.multi_reduction <add>, %133, %cst_58 [2] : vector<1x16x16xf32> to vector<1x16xf32>
    %135 = vector.shape_cast %134 : vector<1x16xf32> to vector<1x16x1xf32>
    %136 = tpu.reciprocal %135 : vector<1x16x1xf32> -> vector<1x16x1xf32>
    %137 = vector.broadcast %136 : vector<1x16x1xf32> to vector<1x16x16xf32>
    %138 = arith.mulf %133, %137 : vector<1x16x16xf32>
    %139 = arith.addf %122, %138 : vector<1x16x16xf32>
    %140 = vector.extract_strided_slice %106 {offsets = [0, 0, 8], sizes = [1, 16, 8], strides = [1, 1, 1]} : vector<1x16x32xf32> to vector<1x16x8xf32>
    "tpu.trace_start"() <{level = 10 : i32, message = "bqk,bkd->bqd"}> : () -> ()
    %cst_59 = arith.constant dense<0.000000e+00> : vector<1x16x8xf32>
    %141 = tpu.matmul %138, %140, %cst_59 {dimension_numbers = #tpu.dot_dimension_numbers<[2], [1], [1], [2], [0, 0, 0, 1, 1, 2], [0], [0]>} : vector<1x16x16xf32>, vector<1x16x8xf32>, vector<1x16x8xf32> -> vector<1x16x8xf32>
    "tpu.trace_stop"() : () -> ()
    %142 = vector.extract_strided_slice %102 {offsets = [0, 0, 16], sizes = [1, 16, 8], strides = [1, 1, 1]} : vector<1x16x32xf32> to vector<1x16x8xf32>
    %143 = vector.extract_strided_slice %104 {offsets = [0, 0, 16], sizes = [1, 16, 8], strides = [1, 1, 1]} : vector<1x16x32xf32> to vector<1x16x8xf32>
    "tpu.trace_start"() <{level = 10 : i32, message = "bqd,bkd->bqk"}> : () -> ()
    %cst_60 = arith.constant dense<0.000000e+00> : vector<1x16x16xf32>
    %144 = tpu.matmul %142, %143, %cst_60 {dimension_numbers = #tpu.dot_dimension_numbers<[2], [2], [1], [1], [0, 0, 0, 1, 1, 1], [0], [0]>} : vector<1x16x8xf32>, vector<1x16x8xf32>, vector<1x16x16xf32> -> vector<1x16x16xf32>
    "tpu.trace_stop"() : () -> ()
    %145 = arith.addf %144, %91 : vector<1x16x16xf32>
    %cst_61 = arith.constant dense<0xFF800000> : vector<1x16xf32>
    %146 = vector.multi_reduction <maximumf>, %145, %cst_61 [2] : vector<1x16x16xf32> to vector<1x16xf32>
    %147 = vector.shape_cast %146 : vector<1x16xf32> to vector<1x16x1xf32>
    %148 = vector.broadcast %147 : vector<1x16x1xf32> to vector<1x16x16xf32>
    %149 = arith.subf %145, %148 : vector<1x16x16xf32>
    %150 = math.exp %149 : vector<1x16x16xf32>
    %cst_62 = arith.constant dense<0.000000e+00> : vector<1x16xf32>
    %151 = vector.multi_reduction <add>, %150, %cst_62 [2] : vector<1x16x16xf32> to vector<1x16xf32>
    %152 = vector.shape_cast %151 : vector<1x16xf32> to vector<1x16x1xf32>
    %153 = tpu.reciprocal %152 : vector<1x16x1xf32> -> vector<1x16x1xf32>
    %154 = vector.broadcast %153 : vector<1x16x1xf32> to vector<1x16x16xf32>
    %155 = arith.mulf %150, %154 : vector<1x16x16xf32>
    %156 = arith.addf %139, %155 : vector<1x16x16xf32>
    %157 = vector.extract_strided_slice %106 {offsets = [0, 0, 16], sizes = [1, 16, 8], strides = [1, 1, 1]} : vector<1x16x32xf32> to vector<1x16x8xf32>
    "tpu.trace_start"() <{level = 10 : i32, message = "bqk,bkd->bqd"}> : () -> ()
    %cst_63 = arith.constant dense<0.000000e+00> : vector<1x16x8xf32>
    %158 = tpu.matmul %155, %157, %cst_63 {dimension_numbers = #tpu.dot_dimension_numbers<[2], [1], [1], [2], [0, 0, 0, 1, 1, 2], [0], [0]>} : vector<1x16x16xf32>, vector<1x16x8xf32>, vector<1x16x8xf32> -> vector<1x16x8xf32>
    "tpu.trace_stop"() : () -> ()
    %159 = vector.extract_strided_slice %102 {offsets = [0, 0, 24], sizes = [1, 16, 8], strides = [1, 1, 1]} : vector<1x16x32xf32> to vector<1x16x8xf32>
    %160 = vector.extract_strided_slice %104 {offsets = [0, 0, 24], sizes = [1, 16, 8], strides = [1, 1, 1]} : vector<1x16x32xf32> to vector<1x16x8xf32>
    "tpu.trace_start"() <{level = 10 : i32, message = "bqd,bkd->bqk"}> : () -> ()
    %cst_64 = arith.constant dense<0.000000e+00> : vector<1x16x16xf32>
    %161 = tpu.matmul %159, %160, %cst_64 {dimension_numbers = #tpu.dot_dimension_numbers<[2], [2], [1], [1], [0, 0, 0, 1, 1, 1], [0], [0]>} : vector<1x16x8xf32>, vector<1x16x8xf32>, vector<1x16x16xf32> -> vector<1x16x16xf32>
    "tpu.trace_stop"() : () -> ()
    %162 = arith.addf %161, %91 : vector<1x16x16xf32>
    %cst_65 = arith.constant dense<0xFF800000> : vector<1x16xf32>
    %163 = vector.multi_reduction <maximumf>, %162, %cst_65 [2] : vector<1x16x16xf32> to vector<1x16xf32>
    %164 = vector.shape_cast %163 : vector<1x16xf32> to vector<1x16x1xf32>
    %165 = vector.broadcast %164 : vector<1x16x1xf32> to vector<1x16x16xf32>
    %166 = arith.subf %162, %165 : vector<1x16x16xf32>
    %167 = math.exp %166 : vector<1x16x16xf32>
    %cst_66 = arith.constant dense<0.000000e+00> : vector<1x16xf32>
    %168 = vector.multi_reduction <add>, %167, %cst_66 [2] : vector<1x16x16xf32> to vector<1x16xf32>
    %169 = vector.shape_cast %168 : vector<1x16xf32> to vector<1x16x1xf32>
    %170 = tpu.reciprocal %169 : vector<1x16x1xf32> -> vector<1x16x1xf32>
    %171 = vector.broadcast %170 : vector<1x16x1xf32> to vector<1x16x16xf32>
    %172 = arith.mulf %167, %171 : vector<1x16x16xf32>
    %173 = arith.addf %156, %172 : vector<1x16x16xf32>
    %174 = vector.extract_strided_slice %106 {offsets = [0, 0, 24], sizes = [1, 16, 8], strides = [1, 1, 1]} : vector<1x16x32xf32> to vector<1x16x8xf32>
    "tpu.trace_start"() <{level = 10 : i32, message = "bqk,bkd->bqd"}> : () -> ()
    %cst_67 = arith.constant dense<0.000000e+00> : vector<1x16x8xf32>
    %175 = tpu.matmul %172, %174, %cst_67 {dimension_numbers = #tpu.dot_dimension_numbers<[2], [1], [1], [2], [0, 0, 0, 1, 1, 2], [0], [0]>} : vector<1x16x16xf32>, vector<1x16x8xf32>, vector<1x16x8xf32> -> vector<1x16x8xf32>
    "tpu.trace_stop"() : () -> ()
    %176 = tpu.concatenate %124, %141, %158, %175 in 2 : vector<1x16x8xf32>, vector<1x16x8xf32>, vector<1x16x8xf32>, vector<1x16x8xf32> -> vector<1x16x32xf32>
    %177 = vector.shape_cast %176 : vector<1x16x32xf32> to vector<16x32xf32>
    %cst_68 = arith.constant dense<0.000000e+00> : vector<16x32xf32>
    %178 = tpu.matmul %177, %7, %cst_68 {dimension_numbers = #tpu.dot_dimension_numbers<[1], [0], [0], [1], [0, 0, 1, 1], [], []>} : vector<16x32xf32>, vector<32x32xf32>, vector<16x32xf32> -> vector<16x32xf32>
    %179 = vector.broadcast %8 : vector<1x32xf32> to vector<16x32xf32>
    %180 = arith.addf %178, %179 : vector<16x32xf32>
    %c0_69 = arith.constant 0 : index
    %c0_70 = arith.constant 0 : index
    %181 = vector.load %arg10[%c0_69, %c0_70] : memref<16x32xf32, #tpu.memory_space<vmem>>, vector<16x32xf32>
    tpu.vector_store %arg10[%c0_69, %c0_70], %180 {strides = array<i32>} : memref<16x32xf32, #tpu.memory_space<vmem>>, vector<16x32xf32>,
    %cst_71 = arith.constant 2.500000e-01 : f32
    %182 = vector.broadcast %cst_71 : f32 to vector<1x16x16xf32>
    %183 = arith.mulf %173, %182 : vector<1x16x16xf32>
    %184 = vector.shape_cast %183 : vector<1x16x16xf32> to vector<16x16xf32>
    %c0_72 = arith.constant 0 : index
    %c0_73 = arith.constant 0 : index
    %185 = vector.load %arg11[%c0_72, %c0_73] : memref<16x16xf32, #tpu.memory_space<vmem>>, vector<16x16xf32>
    tpu.vector_store %arg11[%c0_72, %c0_73], %184 {strides = array<i32>} : memref<16x16xf32, #tpu.memory_space<vmem>>, vector<16x16xf32>,
    return
  }
  func.func @transform_0(%arg0: i32) -> (i32, i32, i32) {
    %c0_i32 = arith.constant 0 : i32
    %c0_i32_0 = arith.constant 0 : i32
    %c0_i32_1 = arith.constant 0 : i32
    return %arg0, %c0_i32, %c0_i32_0 : i32, i32, i32
  }
  func.func @transform_1(%arg0: i32) -> (i32, i32, i32) {
    %c0_i32 = arith.constant 0 : i32
    %c0_i32_0 = arith.constant 0 : i32
    %c0_i32_1 = arith.constant 0 : i32
    return %arg0, %c0_i32, %c0_i32_0 : i32, i32, i32
  }
  func.func @transform_2(%arg0: i32) -> (i32, i32, i32) {
    %c0_i32 = arith.constant 0 : i32
    %c0_i32_0 = arith.constant 0 : i32
    %c0_i32_1 = arith.constant 0 : i32
    return %arg0, %c0_i32, %c0_i32_0 : i32, i32, i32
  }
  func.func @transform_3(%arg0: i32) -> (i32, i32, i32) {
    %c0_i32 = arith.constant 0 : i32
    %c0_i32_0 = arith.constant 0 : i32
    %c0_i32_1 = arith.constant 0 : i32
    return %arg0, %c0_i32, %c0_i32_0 : i32, i32, i32
  }
  func.func @transform_4(%arg0: i32) -> (i32, i32, i32) {
    %c0_i32 = arith.constant 0 : i32
    %c0_i32_0 = arith.constant 0 : i32
    %c0_i32_1 = arith.constant 0 : i32
    return %arg0, %c0_i32, %c0_i32_0 : i32, i32, i32
  }
  func.func @transform_5(%arg0: i32) -> (i32, i32) {
    %c0_i32 = arith.constant 0 : i32
    %c0_i32_0 = arith.constant 0 : i32
    %c0_i32_1 = arith.constant 0 : i32
    return %c0_i32, %c0_i32_0 : i32, i32
  }
  func.func @transform_6(%arg0: i32) -> (i32, i32) {
    %c0_i32 = arith.constant 0 : i32
    %c0_i32_0 = arith.constant 0 : i32
    %c0_i32_1 = arith.constant 0 : i32
    return %c0_i32, %c0_i32_0 : i32, i32
  }
  func.func @transform_7(%arg0: i32) -> (i32, i32) {
    %c0_i32 = arith.constant 0 : i32
    %c0_i32_0 = arith.constant 0 : i32
    %c0_i32_1 = arith.constant 0 : i32
    return %c0_i32, %c0_i32_0 : i32, i32
  }
  func.func @transform_8(%arg0: i32) -> (i32, i32) {
    %c0_i32 = arith.constant 0 : i32
    %c0_i32_0 = arith.constant 0 : i32
    %c0_i32_1 = arith.constant 0 : i32
    return %c0_i32, %c0_i32_0 : i32, i32
  }
  func.func @transform_9(%arg0: i32) -> (i32, i32) {
    %c0_i32 = arith.constant 0 : i32
    %c0_i32_0 = arith.constant 0 : i32
    return %arg0, %c0_i32 : i32, i32
  }
  func.func @transform_10(%arg0: i32) -> (i32, i32) {
    %c0_i32 = arith.constant 0 : i32
    %c0_i32_0 = arith.constant 0 : i32
    return %arg0, %c0_i32 : i32, i32
  }
}

</mosaic_0001>

<bundles_post_ra>
// kernel: multihead_positional_attention_nearby.1
= control target key start
LH: loop header
LB: loop body
LE: loop exit
PB: predicated region body
PF: predicated region fallthrough
CT: control target
= control target key end

     0   :  { %s2881_s0 = inlined_call_operand.vmem [shape: f32[2,16,32], index: 0, kind: input, shape index: {}]   ;;  %s2882_s1 = inlined_call_operand.vmem [shape: f32[2,16,32], index: 1, kind: input, shape index: {}]   ;;  %s2883_s2 = inlined_call_operand.vmem [shape: f32[2,16,32], index: 2, kind: input, shape index: {}]   ;;  %s2884_s3 = inlined_call_operand.vmem [shape: f32[2,16,3], index: 3, kind: input, shape index: {}]   ;;  %s2885_s4 = inlined_call_operand.vmem [shape: f32[2,16,3], index: 4, kind: input, shape index: {}]   ;;  %s2886_s5 = inlined_call_operand.vmem [shape: f32[32,96], index: 5, kind: input, shape index: {}]   ;;  %s2887_s6 = inlined_call_operand.vmem [shape: f32[1,96], index: 6, kind: input, shape index: {}]   ;;  %s2888_s7 = inlined_call_operand.vmem [shape: f32[32,32], index: 7, kind: input, shape index: {}]   ;;  %s2889_s8 = inlined_call_operand.vmem [shape: f32[1,32], index: 8, kind: input, shape index: {}]   ;;  %s2890_s9 = inlined_call_operand.vmem [shape: f32[32,32], index: 9, kind: output, shape index: {0}]   ;;  %s2891_s10 = inlined_call_operand.hbm [shape: f32[32,16], index: 10, kind: output, shape index: {1}]  }
   0x1   :  { %2893 = sst [smem:[#allocation5_spill]] %s2881_s0 }
   0x2   :  { %16 = vsyncpa [#allocation3], 0 }
   0x3   :  { %18 = vsyncpa [#allocation3 + $0x1], 0  ;;  %s2485_s13 = smov 0   ;;  %s2487_s14 = smov 0  }
   0x4   :  { %s2489_s15 = smov 0   ;;  %s2491_s16 = smov 0  }
   0x5 LB: > { %s2506_s17 = sadd.s32 4294967295, %s2411_s16   ;;  %s2055_s18 = sadd.s32 4294967294, %s2411_s16   ;;  %s2411_s16 = sphi %s2491_s16, %s2901_s16   ;;  %s2407_s15 = sphi %s2489_s15, %s2900_s15   ;;  %s2403_s14 = sphi %s2487_s14, %s2899_s14   ;;  %s2399_s13 = sphi %s2485_s13, %s2898_s13  }
   0x6   : > { %s2510_s19 = sadd.s32 1, %s2411_s16   ;;  %s271_s20 = sadd.s32 1, %s2407_s15 }
   0x7   : > { %s268_s21 = ssub.s32 %s2411_s16, %s2510_s19  ;;  %p281_p0 = scmp.ne.s32.totalorder %s2407_s15, %s2403_s14 }
   0x8   : > { %p269_p1 = scmp.eq.s32.totalorder %s268_s21, 0  ;;  %p282_p2 = scmp.eq.s32.totalorder %s2506_s17, 1 }
   0x9   : > { %p287_p3 = scmp.ne.s32.totalorder %s2403_s14, %s2399_s13  ;;  %p288_p4 = scmp.eq.s32.totalorder %s2055_s18, 1 }
   0xa   : > { %s2521_s22 = scalar_select %p269_p1, %s2407_s15, %s271_s20  }
   0xb   : > { %p2523_p5 = por %p282_p2, %p281_p0  ;;  %p2527_p6 = por %p288_p4, %p287_p3 }
   0xc   : > { %p2058_p7 = scmp.ge.s32.totalorder %s2411_s16, 1  ;;  %p358_p8 = scmp.lt.s32.totalorder %s2411_s16, 3 }
   0xe   : > { %p359_p9 = pnand %p2058_p7, %p358_p8 }
   0xf   : > { %p421_p10 = scmp.lt.s32.totalorder (!%p359_p9), %s2506_s17, 1  ;;  %s2896_s0 = sld [smem:[#allocation5_spill]] (!%p359_p9) }
  0x10   : > { %362 = sbr.rel (%p359_p9) target bundleno = 3739 (0xe9b), region = 56  ;;  %s2415_s30 = smov (!%p359_p9), 96  }
  0x11   : > { %s2416_s20 = smov (!%p359_p9), 120   ;;  %s2417_s21 = smov (!%p359_p9), 80  }
  0x12   : > { %s2420_s27 = smov (!%p359_p9), 56   ;;  %s2421_s28 = smov (!%p359_p9), 48  }
  0x13   : > { %s2424_s11 = smov (!%p359_p9), 40  }
  0x15   : > { %s422_s25 = scalar_select %p421_p10, %s2506_s17, 1  ;;  %vm475_vm0 = vcmask 23552   ;;  %v579_v12 = vlaneseq  ;;  %vm590_vm1 = vcmask 130112   ;;  %vm611_vm2 = vcmask 130048  }
  0x17   : > { %s2535_s26 = sshll.u32 %s422_s25, 4  ;;  %v2555_v13 = vand.u32 127, %v579_v12  ;;  %v582_v15 = vshrl.u32 %v579_v12, 7 }
  0x18   : > { %s440_s29 = scalar_lea.vmem %s2884_s3, %s2535_s26  ;;  %s445_s12 = scalar_lea.vmem %s2885_s4, %s2535_s26 }
  0x19   : > { %v460_v0 = vld [vmem:[%s440_s29 + $0x8] sm:$0xff]  ;;  %v459_v1 = vld [vmem:[%s440_s29] sm:$0xff]  ;;  %v585_v16 = vadd.s32 4294967288, %v2555_v13  ;;  %v583_v17 = vsub.s32 %v2555_v13, %v582_v15  ;;  %s425_s29 = scalar_lea.vmem %s2896_s0, %s2535_s26  ;;  %s430_s25 = scalar_lea.vmem %s2882_s1, %s2535_s26 }
  0x1a   : > { %v461_v2 = vld [vmem:[%s445_s12] sm:$0xff]  ;;  %2173 = vmatprep.subr.msk.mxu0 %vm475_vm0, %v460_v0  ;;  %v462_v3 = vld [vmem:[%s445_s12 + $0x8] sm:$0xff]  ;;  %v482_v5 = vmul.f32 %v459_v1, %v459_v1  ;;  %v483_v6 = vmul.f32 %v460_v0, %v460_v0  ;;  %s435_s18 = scalar_lea.vmem %s2883_s2, %s2535_s26  ;;  %s2418_s26 = smov 112  }
  0x1b   : > { %v473_v4 = vmul.f32 %v461_v2, %v461_v2  ;;  %2177 = vmatprep.mubr.msk.f32.mxu0 %vm475_vm0, %v461_v2  ;;  %2174 = vmatpush3.xpose.msk.msra.mxu0 %vm475_vm0, %v460_v0  ;;  %v474_v7 = vmul.f32 %v462_v3, %v462_v3  ;;  %v588_v18 = vsub.s32 %v585_v16, %v582_v15  ;;  %s2892_s12 = smov 8  }
  0x1c   : > { %2175 = vmatprep.subr.msk.mxu0 %vm475_vm0, %v459_v1  ;;  %v484_v8 = vsel %vm475_vm0, %v482_v5, 0.0  ;;  %v487_v10 = vsel %vm475_vm0, %v483_v6, 0.0 }
  0x1d   : > { %v476_v9 = vsel %vm475_vm0, %v473_v4, 0.0  ;;  %485 = vadd.xlane.f32.xlu0 %v484_v8  ;;  %v479_v11 = vsel %vm475_vm0, %v474_v7, 0.0 }
  0x1e   : > { %477 = vadd.xlane.f32.xlu1 %v476_v9 }
  0x1f   : > { %2176 = vmatpush3.xpose.msk.msra.mxu0 %vm475_vm0, %v459_v1 }
  0x21   : > { %488 = vadd.xlane.f32.xlu0 %v487_v10 }
  0x22   : > { %480 = vadd.xlane.f32.xlu1 %v479_v11  ;;  %2178 = vmatmul.mubr.msk.f32.vlgmr.msra.gmra.mxu0 %vm475_vm0, %v462_v3 }
  0xa6   : > { %v486_v14 = vpop.xlane.xlu0 %485 }
  0xa7   : > { %v478_v20 = vpop.xlane.xlu1 %477  ;;  %v584_v21 = vrot.slane %v486_v14, %v583_v17 }
  0xaa   : > { %v489_v19 = vpop.xlane.xlu0 %488 }
  0xab   : > { %v589_v22 = vrot.slane %v489_v19, %v588_v18  ;;  %v481_v23 = vpop.xlane.xlu1 %480 }
  0xad   : > { %v591_v24 = vsel %vm590_vm1, %v589_v22, %v584_v21 }
  0xae   : > { %v606_v26 = vadd.f32 %v591_v24, %v481_v23  ;;  %v605_v29 = vadd.f32 %v591_v24, %v478_v20 }
  0xe2   : > { %v2179_v25 = vpop.f32.mrf.mxu0 }
  0xe3   : > { %v608_v27 = vmul.f32 2.0, %v2179_v25 }
  0xe4   : > { %v568_v28 = vpop.f32.mrf.mxu0 }
  0xe5   : > { %v610_v30 = vsub.f32 %v606_v26, %v608_v27  ;;  %v607_v31 = vmul.f32 2.0, %v568_v28 }
  0xe7   : > { %v609_v32 = vsub.f32 %v605_v29, %v607_v31  ;;  %v615_v33 = vsel %vm611_vm2, %v610_v30, inf  ;;  %v2413_v31 = vmov -1e+09  }
  0xe8   : > { %616 = vmin.xlane.f32.xlu1 %v615_v33 }
  0xe9   : > { %v612_v34 = vsel %vm611_vm2, %v609_v32, inf }
  0xea   : > { %613 = vmin.xlane.f32.xlu0 %v612_v34 }
 0x171   : > { %v617_v35 = vpop.xlane.xlu1 %616 }
 0x172   : > { %vm619_vm3 = vcmp.eq.f32.partialorder %v610_v30, %v617_v35 }
 0x173   : > { %v621_v36 = vsel %vm619_vm3, %v2555_v13, 16  ;;  %v614_v37 = vpop.xlane.xlu0 %613 }
 0x174   : > { %v637_v38 = vsel %vm611_vm2, %v621_v36, 2147483647  ;;  %vm618_vm4 = vcmp.eq.f32.partialorder %v609_v32, %v614_v37 }
 0x175   : > { %v620_v39 = vsel %vm618_vm4, %v2555_v13, 16  ;;  %v639_v40 = vshra.s32 %v637_v38, 16  ;;  %v638_v45 = vand.u32 65535, %v637_v38  ;;  %vm846_vm4 = vcmask 261120  }
 0x176   : > { %v622_v41 = vsel %vm611_vm2, %v620_v39, 2147483647 }
 0x177   : > { %v641_v42 = vcvt.s32.f32 %v639_v40  ;;  %v624_v43 = vshra.s32 %v622_v41, 16  ;;  %v623_v46 = vand.u32 65535, %v622_v41  ;;  %v640_v48 = vcvt.s32.f32 %v638_v45 }
 0x179   : > { %642 = vmin.xlane.f32.xlu1 %v641_v42  ;;  %v626_v44 = vcvt.s32.f32 %v624_v43  ;;  %v625_v51 = vcvt.s32.f32 %v623_v46 }
 0x17b   : > { %627 = vmin.xlane.f32.xlu0 %v626_v44 }
 0x202   : > { %v643_v47 = vpop.xlane.xlu1 %642 }
 0x203   : > { %vm644_vm5 = vcmp.eq.f32.partialorder %v641_v42, %v643_v47  ;;  %v649_v53 = vcvt.f32.s32 %v643_v47 }
 0x204   : > { %v628_v49 = vpop.xlane.xlu0 %627  ;;  %v645_v50 = vsel %vm644_vm5, %v640_v48, inf }
 0x205   : > { %646 = vmin.xlane.f32.xlu1 %v645_v50  ;;  %vm629_vm6 = vcmp.eq.f32.partialorder %v626_v44, %v628_v49  ;;  %v634_v54 = vcvt.f32.s32 %v628_v49  ;;  %v650_v56 = vshll.u32 %v649_v53, 16 }
 0x206   : > { %v630_v52 = vsel %vm629_vm6, %v625_v51, inf }
 0x207   : > { %631 = vmin.xlane.f32.xlu0 %v630_v52  ;;  %v635_v59 = vshll.u32 %v634_v54, 16 }
 0x28e   : > { %v647_v55 = vpop.xlane.xlu1 %646 }
 0x28f   : > { %v648_v57 = vcvt.f32.s32 %v647_v55 }
 0x290   : > { %v632_v58 = vpop.xlane.xlu0 %631 }
 0x291   : > { %v651_v60 = vadd.s32 %v650_v56, %v648_v57  ;;  %v633_v61 = vcvt.f32.s32 %v632_v58 }
 0x293   : > { %v636_v62 = vadd.s32 %v635_v59, %v633_v61  ;;  %vm653_vm7 = vcmp.eq.s32.totalorder %v2555_v13, %v651_v60  ;;  %v466_v59 = vld [vmem:[%s2886_s5 + $0x18] sm:$0xff]  ;;  %v465_v60 = vld [vmem:[%s2886_s5 + $0x10] sm:$0xff]  ;;  %v453_v61 = vld [vmem:[%s425_s29] sm:$0xff] }
 0x294   : > { %v657_v63 = vsel %vm653_vm7, inf, %v610_v30  ;;  %2180 = vmatprep.subr.mxu1 %v466_v59  ;;  %2188 = vmatprep.mubr.msk.f32.mxu1 %vm846_vm4, %v453_v61 }
 0x295   : > { %v661_v0 = vsel %vm611_vm2, %v657_v63, inf  ;;  %vm652_vm8 = vcmp.eq.s32.totalorder %v2555_v13, %v636_v62  ;;  %2181 = vmatpush3.msra.mxu1 %v466_v59  ;;  %v464_v62 = vld [vmem:[%s2886_s5 + $0x8] sm:$0xff] }
 0x296   : > { %662 = vmin.xlane.f32.xlu1 %v661_v0  ;;  %v656_v1 = vsel %vm652_vm8, inf, %v609_v32  ;;  %v655_v32 = vsel %vm653_vm7, 0.0, %v2413_v31  ;;  %v654_v36 = vsel %vm652_vm8, 0.0, %v2413_v31  ;;  %2182 = vmatprep.subr.mxu1 %v465_v60  ;;  %v454_v0 = vld [vmem:[%s425_s29 + $0x8] sm:$0xff]  ;;  %v2652_v31 = vld [vmem:[%s2887_s6] ss:$0 sm:$0xff] }
 0x297   : > { %v658_v2 = vsel %vm611_vm2, %v656_v1, inf  ;;  %2183 = vmatpush3.msra.mxu1 %v465_v60  ;;  %s2414_s29 = smov 88  }
 0x298   : > { %659 = vmin.xlane.f32.xlu0 %v658_v2  ;;  %2184 = vmatprep.subr.mxu1 %v464_v62  ;;  %v456_v2 = vld [vmem:[%s430_s25 + $0x8] sm:$0xff] }
 0x299   : > { %2185 = vmatpush3.msra.mxu1 %v464_v62 }
 0x31f   : > { %v663_v3 = vpop.xlane.xlu1 %662 }
 0x320   : > { %vm665_vm9 = vcmp.eq.f32.partialorder %v657_v63, %v663_v3 }
 0x321   : > { %v667_v4 = vsel %vm665_vm9, %v2555_v13, 16  ;;  %v660_v5 = vpop.xlane.xlu0 %659  ;;  %vm968_vm9 = vcmask 64512  }
 0x322   : > { %v683_v6 = vsel %vm611_vm2, %v667_v4, 2147483647  ;;  %vm664_vm10 = vcmp.eq.f32.partialorder %v656_v1, %v660_v5 }
 0x323   : > { %v666_v7 = vsel %vm664_vm10, %v2555_v13, 16  ;;  %v685_v8 = vshra.s32 %v683_v6, 16  ;;  %v684_v14 = vand.u32 65535, %v683_v6 }
 0x324   : > { %v668_v9 = vsel %vm611_vm2, %v666_v7, 2147483647 }
 0x325   : > { %v687_v10 = vcvt.s32.f32 %v685_v8  ;;  %v670_v11 = vshra.s32 %v668_v9, 16  ;;  %v669_v15 = vand.u32 65535, %v668_v9  ;;  %v686_v17 = vcvt.s32.f32 %v684_v14 }
 0x327   : > { %688 = vmin.xlane.f32.xlu1 %v687_v10  ;;  %v672_v12 = vcvt.s32.f32 %v670_v11  ;;  %v671_v20 = vcvt.s32.f32 %v669_v15 }
 0x329   : > { %673 = vmin.xlane.f32.xlu0 %v672_v12 }
 0x3b0   : > { %v689_v16 = vpop.xlane.xlu1 %688 }
 0x3b1   : > { %vm690_vm11 = vcmp.eq.f32.partialorder %v687_v10, %v689_v16  ;;  %v695_v22 = vcvt.f32.s32 %v689_v16 }
 0x3b2   : > { %v674_v18 = vpop.xlane.xlu0 %673  ;;  %v691_v19 = vsel %vm690_vm11, %v686_v17, inf }
 0x3b3   : > { %692 = vmin.xlane.f32.xlu1 %v691_v19  ;;  %vm675_vm12 = vcmp.eq.f32.partialorder %v672_v12, %v674_v18  ;;  %v680_v23 = vcvt.f32.s32 %v674_v18  ;;  %v696_v25 = vshll.u32 %v695_v22, 16 }
 0x3b4   : > { %v676_v21 = vsel %vm675_vm12, %v671_v20, inf }
 0x3b5   : > { %677 = vmin.xlane.f32.xlu0 %v676_v21  ;;  %v681_v28 = vshll.u32 %v680_v23, 16 }
 0x43c   : > { %v693_v24 = vpop.xlane.xlu1 %692 }
 0x43d   : > { %v694_v26 = vcvt.f32.s32 %v693_v24 }
 0x43e   : > { %v678_v27 = vpop.xlane.xlu0 %677 }
 0x43f   : > { %v697_v29 = vadd.s32 %v696_v25, %v694_v26  ;;  %v679_v30 = vcvt.f32.s32 %v678_v27 }
 0x441   : > { %v682_v33 = vadd.s32 %v681_v28, %v679_v30  ;;  %vm699_vm13 = vcmp.eq.s32.totalorder %v2555_v13, %v697_v29 }
 0x442   : > { %v2580_v34 = vsel %vm699_vm13, inf, %v657_v63  ;;  %v2582_v35 = vsel %vm699_vm13, 0.0, %v655_v32  ;;  %v463_v63 = vld [vmem:[%s2886_s5] sm:$0xff] }
 0x443   : > { %v707_v37 = vsel %vm611_vm2, %v2580_v34, inf  ;;  %vm698_vm14 = vcmp.eq.s32.totalorder %v2555_v13, %v682_v33  ;;  %2186 = vmatprep.subr.mxu1 %v463_v63 }
 0x444   : > { %708 = vmin.xlane.f32.xlu1 %v707_v37  ;;  %v2589_v38 = vsel %vm698_vm14, inf, %v656_v1  ;;  %v2591_v39 = vsel %vm698_vm14, 0.0, %v654_v36  ;;  %v455_v1 = vld [vmem:[%s430_s25] sm:$0xff]  ;;  %2187 = vmatpush3.msra.mxu1 %v463_v63  ;;  %s2419_s25 = smov 64  }
 0x445   : > { %v704_v40 = vsel %vm611_vm2, %v2589_v38, inf  ;;  %2189 = vmatmul.mubr.msk.f32.vlgmr.msra.gmra.mxu1 %vm846_vm4, %v454_v0 }
 0x446   : > { %705 = vmin.xlane.f32.xlu0 %v704_v40  ;;  %2191 = vmatprep.mubr.msk.f32.mxu1 %vm846_vm4, %v455_v1 }
 0x449   : > { %2192 = vmatmul.mubr.msk.f32.gmra.mxu1 %vm846_vm4, %v456_v2 }
 0x4cd   : > { %v709_v41 = vpop.xlane.xlu1 %708 }
 0x4ce   : > { %vm711_vm15 = vcmp.eq.f32.partialorder %v2580_v34, %v709_v41 }
 0x4cf   : > { %v713_v42 = vsel %vm711_vm15, %v2555_v13, 16  ;;  %v706_v43 = vpop.xlane.xlu0 %705 }
 0x4d0   : > { %v729_v44 = vsel %vm611_vm2, %v713_v42, 2147483647  ;;  %vm710_vm0 = vcmp.eq.f32.partialorder %v2589_v38, %v706_v43 }
 0x4d1   : > { %v712_v45 = vsel %vm710_vm0, %v2555_v13, 16  ;;  %v731_v46 = vshra.s32 %v729_v44, 16  ;;  %v730_v51 = vand.u32 65535, %v729_v44 }
 0x4d2   : > { %v714_v47 = vsel %vm611_vm2, %v712_v45, 2147483647 }
 0x4d3   : > { %v733_v48 = vcvt.s32.f32 %v731_v46  ;;  %v716_v49 = vshra.s32 %v714_v47, 16  ;;  %v715_v52 = vand.u32 65535, %v714_v47  ;;  %v732_v54 = vcvt.s32.f32 %v730_v51 }
 0x4d5   : > { %734 = vmin.xlane.f32.xlu1 %v733_v48  ;;  %v718_v50 = vcvt.s32.f32 %v716_v49  ;;  %v717_v57 = vcvt.s32.f32 %v715_v52  ;;  %v458_v49 = vld [vmem:[%s435_s18 + $0x8] sm:$0xff] }
 0x4d7   : > { %719 = vmin.xlane.f32.xlu0 %v718_v50 }
 0x505   : > { %v2190_v30 = vpop.f32.mrf.mxu1 }
 0x506   : > { %v937_v47 = vadd.f32 %v2190_v30, %v2652_v31 }
 0x507   : > { %v931_v32 = vpop.f32.mrf.mxu1 }
 0x508   : > { %v932_v33 = vadd.f32 %v2652_v31, %v931_v32 }
 0x509   : > { %v2193_v43 = vpop.f32.mrf.mxu1 }
 0x50a   : > { %v2660_v44 = vadd.f32 %v2193_v43, %v2652_v31 }
 0x50b   : > { %v941_v45 = vpop.f32.mrf.mxu1 }
 0x50c   : > { %v2664_v46 = vadd.f32 %v2652_v31, %v941_v45 }
 0x55e   : > { %v735_v53 = vpop.xlane.xlu1 %734 }
 0x55f   : > { %vm736_vm1 = vcmp.eq.f32.partialorder %v733_v48, %v735_v53  ;;  %v741_v3 = vcvt.f32.s32 %v735_v53  ;;  %v457_v48 = vld [vmem:[%s435_s18] sm:$0xff]  ;;  %s2426_s18 = smov 16  }
 0x560   : > { %v720_v55 = vpop.xlane.xlu0 %719  ;;  %v737_v56 = vsel %vm736_vm1, %v732_v54, inf  ;;  %2194 = vmatprep.mubr.msk.f32.mxu1 %vm846_vm4, %v457_v48 }
 0x561   : > { %738 = vmin.xlane.f32.xlu1 %v737_v56  ;;  %vm721_vm3 = vcmp.eq.f32.partialorder %v718_v50, %v720_v55  ;;  %v726_v4 = vcvt.f32.s32 %v720_v55  ;;  %v742_v6 = vshll.u32 %v741_v3, 16  ;;  %2195 = vmatmul.mubr.msk.f32.gmra.mxu1 %vm846_vm4, %v458_v49  ;;  %v2676_v50 = vmul.f32 0.35355338, %v937_v47 }
 0x562   : > { %v722_v58 = vsel %vm721_vm3, %v717_v57, inf }
 0x563   : > { %723 = vmin.xlane.f32.xlu0 %v722_v58  ;;  %v727_v9 = vshll.u32 %v726_v4, 16 }
 0x5ea   : > { %v739_v5 = vpop.xlane.xlu1 %738 }
 0x5eb   : > { %v740_v7 = vcvt.f32.s32 %v739_v5 }
 0x5ec   : > { %v724_v8 = vpop.xlane.xlu0 %723 }
 0x5ed   : > { %v743_v10 = vadd.s32 %v742_v6, %v740_v7  ;;  %v725_v11 = vcvt.f32.s32 %v724_v8 }
 0x5ef   : > { %v728_v12 = vadd.s32 %v727_v9, %v725_v11  ;;  %vm745_vm5 = vcmp.eq.s32.totalorder %v2555_v13, %v743_v10 }
 0x5f0   : > { %v2627_v14 = vsel %vm745_vm5, inf, %v2580_v34  ;;  %v2630_v15 = vsel %vm745_vm5, 0.0, %v2582_v35  ;;  %v2655_v34 = vmul.f32 0.35355338, %v932_v33 }
 0x5f1   : > { %v753_v16 = vsel %vm611_vm2, %v2627_v14, inf  ;;  %vm744_vm6 = vcmp.eq.s32.totalorder %v2555_v13, %v728_v12 }
 0x5f2   : > { %754 = vmin.xlane.f32.xlu1 %v753_v16  ;;  %v2636_v17 = vsel %vm744_vm6, inf, %v2589_v38  ;;  %v2639_v18 = vsel %vm744_vm6, 0.0, %v2591_v39  ;;  %2201 = vmatprep.mubr.msk.f32.mxu0 %vm968_vm9, %v2655_v34  ;;  %vm1801_vm6 = vcmask 195584  }
 0x5f3   : > { %v750_v19 = vsel %vm611_vm2, %v2636_v17, inf }
 0x5f4   : > { %751 = vmin.xlane.f32.xlu0 %v750_v19 }
 0x621   : > { %v2196_v33 = vpop.f32.mrf.mxu1 }
 0x67b   : > { %v755_v20 = vpop.xlane.xlu1 %754 }
 0x67c   : > { %vm757_vm7 = vcmp.eq.f32.partialorder %v2627_v14, %v755_v20 }
 0x67d   : > { %v759_v21 = vsel %vm757_vm7, %v2555_v13, 16  ;;  %v752_v22 = vpop.xlane.xlu0 %751 }
 0x67e   : > { %v775_v23 = vsel %vm611_vm2, %v759_v21, 2147483647  ;;  %vm756_vm8 = vcmp.eq.f32.partialorder %v2636_v17, %v752_v22 }
 0x67f   : > { %v758_v24 = vsel %vm756_vm8, %v2555_v13, 16  ;;  %v777_v25 = vshra.s32 %v775_v23, 16  ;;  %v776_v35 = vand.u32 65535, %v775_v23 }
 0x680   : > { %v760_v26 = vsel %vm611_vm2, %v758_v24, 2147483647 }
 0x681   : > { %v779_v27 = vcvt.s32.f32 %v777_v25  ;;  %v762_v28 = vshra.s32 %v760_v26, 16  ;;  %v761_v36 = vand.u32 65535, %v760_v26  ;;  %v778_v38 = vcvt.s32.f32 %v776_v35  ;;  %v951_v35 = vpop.f32.mrf.mxu1 }
 0x683   : > { %780 = vmin.xlane.f32.xlu1 %v779_v27  ;;  %v764_v29 = vcvt.s32.f32 %v762_v28  ;;  %v763_v41 = vcvt.s32.f32 %v761_v36 }
 0x685   : > { %765 = vmin.xlane.f32.xlu0 %v764_v29 }
 0x70c   : > { %v781_v37 = vpop.xlane.xlu1 %780 }
 0x70d   : > { %vm782_vm10 = vcmp.eq.f32.partialorder %v779_v27, %v781_v37  ;;  %v787_v51 = vcvt.f32.s32 %v781_v37 }
 0x70e   : > { %v766_v39 = vpop.xlane.xlu0 %765  ;;  %v783_v40 = vsel %vm782_vm10, %v778_v38, inf }
 0x70f   : > { %784 = vmin.xlane.f32.xlu1 %v783_v40  ;;  %vm767_vm11 = vcmp.eq.f32.partialorder %v764_v29, %v766_v39  ;;  %v772_v52 = vcvt.f32.s32 %v766_v39  ;;  %v788_v54 = vshll.u32 %v787_v51, 16 }
 0x710   : > { %v768_v42 = vsel %vm767_vm11, %v763_v41, inf }
 0x711   : > { %769 = vmin.xlane.f32.xlu0 %v768_v42  ;;  %v773_v57 = vshll.u32 %v772_v52, 16 }
 0x720   : > { %1173 = vrot.lane.b32.xlu1 %v2660_v44, %s2414_s29 }
 0x724   : > { %964 = vrot.lane.b32.xlu1 %v2664_v46, %s2415_s30 }
 0x727   : > { %966 = vrot.lane.b32.xlu0 %v2660_v44, %s2415_s30  ;;  %s2423_s30 = smov 104  }
 0x728   : > { %1171 = vrot.lane.b32.xlu1 %v2664_v46, %s2414_s29  ;;  %s2422_s29 = smov 72  }
 0x72b   : > { %1167 = vrot.lane.b32.xlu0 %v2655_v34, %s2416_s20 }
 0x72c   : > { %1375 = vrot.lane.b32.xlu1 %v2660_v44, %s2417_s21 }
 0x72f   : > { %1169 = vrot.lane.b32.xlu0 %v2676_v50, %s2416_s20  ;;  %s418_s20 = sand.u32 1, %s2403_s14  }
 0x730   : > { %1373 = vrot.lane.b32.xlu1 %v2664_v46, %s2417_s21  ;;  %s2059_s21 = sshll.u32 %s418_s20, 4 }
 0x733   : > { %1369 = vrot.lane.b32.xlu0 %v2655_v34, %s2418_s26 }
 0x734   : > { %1371 = vrot.lane.b32.xlu1 %v2676_v50, %s2418_s26  ;;  %s2793_s26 = scalar_lea.vmem [#allocation2], %s2059_s21 }
 0x798   : > { %v785_v53 = vpop.xlane.xlu1 %784 }
 0x799   : > { %v786_v55 = vcvt.f32.s32 %v785_v53 }
 0x79a   : > { %v770_v56 = vpop.xlane.xlu0 %769 }
 0x79b   : > { %v789_v58 = vadd.s32 %v788_v54, %v786_v55  ;;  %v771_v59 = vcvt.f32.s32 %v770_v56 }
 0x79c   : > { %v1174_v60 = vpop.permute.xlu1 %1173 }
 0x79d   : > { %v774_v61 = vadd.s32 %v773_v57, %v771_v59  ;;  %vm791_vm12 = vcmp.eq.s32.totalorder %v2555_v13, %v789_v58  ;;  %2211 = vmatprep.subr.msk.mxu1 %vm968_vm9, %v1174_v60 }
 0x79e   : > { %v967_v62 = vpop.permute.xlu0 %966  ;;  %v2687_v63 = vsel %vm791_vm12, 0.0, %v2630_v15  ;;  %v795_v0 = vsel %vm791_vm12, inf, %v2627_v14  ;;  %2212 = vmatpush3.xpose.msk.msra.mxu1 %vm968_vm9, %v1174_v60 }
 0x79f   : > { %2197 = vmatprep.subr.msk.mxu0 %vm968_vm9, %v967_v62  ;;  %v799_v1 = vsel %vm611_vm2, %v795_v0, inf  ;;  %vm790_vm13 = vcmp.eq.s32.totalorder %v2555_v13, %v774_v61 }
 0x7a0   : > { %2198 = vmatpush3.xpose.msk.msra.mxu0 %vm968_vm9, %v967_v62  ;;  %800 = vmin.xlane.f32.xlu1 %v799_v1  ;;  %v965_v2 = vpop.permute.xlu1 %964  ;;  %v2696_v3 = vsel %vm790_vm13, 0.0, %v2639_v18  ;;  %v794_v4 = vsel %vm790_vm13, inf, %v2636_v17 }
 0x7a1   : > { %v796_v5 = vsel %vm611_vm2, %v794_v4, inf  ;;  %2199 = vmatprep.subr.msk.mxu0 %vm968_vm9, %v965_v2 }
 0x7a2   : > { %797 = vmin.xlane.f32.xlu0 %v796_v5  ;;  %v1168_v6 = vpop.permute.xlu0 %1167  ;;  %v2742_v5 = vadd.f32 %v2196_v33, %v2652_v31 }
 0x7a3   : > { %2215 = vmatprep.mubr.msk.f32.mxu1 %vm968_vm9, %v1168_v6 }
 0x7a4   : > { %2200 = vmatpush3.xpose.msk.msra.mxu0 %vm968_vm9, %v965_v2  ;;  %v1172_v7 = vpop.permute.xlu1 %1171 }
 0x7a5   : > { %2213 = vmatprep.subr.msk.mxu1 %vm968_vm9, %v1172_v7 }
 0x7a6   : > { %2214 = vmatpush3.xpose.msk.msra.mxu1 %vm968_vm9, %v1172_v7  ;;  %v1170_v8 = vpop.permute.xlu0 %1169 }
 0x7a7   : > { %2202 = vmatmul.mubr.msk.f32.vlgmr.msra.gmra.mxu0 %vm968_vm9, %v2676_v50 }
 0x7a8   : > { %v1376_v9 = vpop.permute.xlu1 %1375 }
 0x7a9   : > { %2225 = vmatprep.subr.msk.mxu1 %vm968_vm9, %v1376_v9  ;;  %2216 = vmatmul.mubr.msk.f32.vlgmr.msra.gmra.mxu1 %vm968_vm9, %v1170_v8 }
 0x7aa   : > { %2226 = vmatpush3.xpose.msk.msra.mxu1 %vm968_vm9, %v1376_v9  ;;  %v1370_v10 = vpop.permute.xlu0 %1369 }
 0x7ab   : > { %2229 = vmatprep.mubr.msk.f32.mxu1 %vm968_vm9, %v1370_v10 }
 0x7ac   : > { %v1374_v11 = vpop.permute.xlu1 %1373 }
 0x7ad   : > { %2227 = vmatprep.subr.msk.mxu1 %vm968_vm9, %v1374_v11 }
 0x7ae   : > { %2228 = vmatpush3.xpose.msk.msra.mxu1 %vm968_vm9, %v1374_v11 }
 0x7b0   : > { %v1372_v12 = vpop.permute.xlu1 %1371 }
 0x7b1   : > { %2230 = vmatmul.mubr.msk.f32.vlgmr.msra.gmra.mxu1 %vm968_vm9, %v1372_v12 }
 0x829   : > { %v801_v14 = vpop.xlane.xlu1 %800 }
 0x82a   : > { %vm803_vm14 = vcmp.eq.f32.partialorder %v795_v0, %v801_v14 }
 0x82b   : > { %v805_v15 = vsel %vm803_vm14, %v2555_v13, 16  ;;  %v798_v16 = vpop.xlane.xlu0 %797 }
 0x82c   : > { %vm802_vm15 = vcmp.eq.f32.partialorder %v794_v4, %v798_v16  ;;  %v821_v18 = vsel %vm611_vm2, %v805_v15, 2147483647  ;;  %v2739_v4 = vadd.f32 %v2652_v31, %v951_v35 }
 0x82d   : > { %v804_v17 = vsel %vm802_vm15, %v2555_v13, 16  ;;  %v823_v22 = vshra.s32 %v821_v18, 16  ;;  %v822_v27 = vand.u32 65535, %v821_v18 }
 0x82e   : > { %v806_v19 = vsel %vm611_vm2, %v804_v17, 2147483647 }
 0x82f   : > { %v808_v20 = vshra.s32 %v806_v19, 16  ;;  %v825_v23 = vcvt.s32.f32 %v823_v22  ;;  %v807_v24 = vand.u32 65535, %v806_v19  ;;  %v824_v30 = vcvt.s32.f32 %v822_v27 }
 0x831   : > { %v810_v21 = vcvt.s32.f32 %v808_v20  ;;  %v809_v26 = vcvt.s32.f32 %v807_v24 }
 0x833   : > { %811 = vmin.xlane.f32.xlu0 %v810_v21 }
 0x837   : > { %826 = vmin.xlane.f32.xlu0 %v825_v23 }
 0x867   : > { %v2203_v42 = vpop.f32.mrf.mxu0 }
 0x869   : > { %v2217_v37 = vpop.f32.mrf.mxu1  ;;  %v1045_v51 = vpop.f32.mrf.mxu0 }
 0x86b   : > { %v1249_v45 = vpop.f32.mrf.mxu1 }
 0x871   : > { %v2231_v55 = vpop.f32.mrf.mxu1 }
 0x873   : > { %v1451_v60 = vpop.f32.mrf.mxu1 }
 0x8bc   : > { %v812_v25 = vpop.xlane.xlu0 %811 }
 0x8bd   : > { %vm813_vm0 = vcmp.eq.f32.partialorder %v810_v21, %v812_v25  ;;  %v818_v36 = vcvt.f32.s32 %v812_v25 }
 0x8be   : > { %v814_v28 = vsel %vm813_vm0, %v809_v26, inf }
 0x8bf   : > { %815 = vmin.xlane.f32.xlu0 %v814_v28  ;;  %v819_v39 = vshll.u32 %v818_v36, 16 }
 0x8c0   : > { %v827_v29 = vpop.xlane.xlu0 %826 }
 0x8c1   : > { %vm828_vm1 = vcmp.eq.f32.partialorder %v825_v23, %v827_v29  ;;  %v833_v40 = vcvt.f32.s32 %v827_v29 }
 0x8c2   : > { %v829_v32 = vsel %vm828_vm1, %v824_v30, inf }
 0x8c3   : > { %830 = vmin.xlane.f32.xlu1 %v829_v32  ;;  %v834_v48 = vshll.u32 %v833_v40, 16 }
 0x948   : > { %v816_v38 = vpop.xlane.xlu0 %815 }
 0x949   : > { %v817_v41 = vcvt.f32.s32 %v816_v38 }
 0x94b   : > { %v820_v43 = vadd.s32 %v819_v39, %v817_v41 }
 0x94c   : > { %v831_v47 = vpop.xlane.xlu1 %830 }
 0x94d   : > { %vm836_vm3 = vcmp.eq.s32.totalorder %v2555_v13, %v820_v43  ;;  %v832_v49 = vcvt.f32.s32 %v831_v47 }
 0x94e   : > { %v2720_v52 = vsel %vm836_vm3, 0.0, %v2696_v3 }
 0x94f   : > { %v835_v53 = vadd.s32 %v834_v48, %v832_v49  ;;  %v1046_v54 = vadd.f32 %v1045_v51, %v2720_v52  ;;  %v1250_v57 = vadd.f32 %v1249_v45, %v2720_v52  ;;  %v1452_v1 = vadd.f32 %v1451_v60, %v2720_v52 }
 0x951   : > { %vm837_vm5 = vcmp.eq.s32.totalorder %v2555_v13, %v835_v53  ;;  %v1054_v56 = vsel %vm611_vm2, %v1046_v54, -inf  ;;  %v1258_v62 = vsel %vm611_vm2, %v1250_v57, -inf  ;;  %v1460_v2 = vsel %vm611_vm2, %v1452_v1, -inf }
 0x952   : > { %v2727_v58 = vsel %vm837_vm5, 0.0, %v2687_v63  ;;  %1055 = vmax.xlane.f32.xlu0 %v1054_v56 }
 0x953   : > { %v1051_v59 = vadd.f32 %v2203_v42, %v2727_v58  ;;  %v1255_v0 = vadd.f32 %v2217_v37, %v2727_v58  ;;  %v1457_v63 = vadd.f32 %v2231_v55, %v2727_v58 }
 0x955   : > { %v1057_v61 = vsel %vm611_vm2, %v1051_v59, -inf  ;;  %v1261_v13 = vsel %vm611_vm2, %v1255_v0, -inf  ;;  %v1463_v3 = vsel %vm611_vm2, %v1457_v63, -inf }
 0x956   : > { %1058 = vmax.xlane.f32.xlu1 %v1057_v61  ;;  %1259 = vmax.xlane.f32.xlu0 %v1258_v62 }
 0x95a   : > { %1262 = vmax.xlane.f32.xlu1 %v1261_v13  ;;  %1461 = vmax.xlane.f32.xlu0 %v1460_v2 }
 0x95e   : > { %1464 = vmax.xlane.f32.xlu1 %v1463_v3 }
 0x96f   : > { %1080 = vrot.lane.b32.xlu1 %v2739_v4, %s2419_s25 }
 0x970   : > { %1082 = vrot.lane.b32.xlu0 %v2742_v5, %s2419_s25  ;;  %s2427_s25 = smov 24  }
 0x973   : > { %1284 = vrot.lane.b32.xlu1 %v2742_v5, %s2420_s27 }
 0x974   : > { %1486 = vrot.lane.b32.xlu0 %v2742_v5, %s2421_s28 }
 0x977   : > { %1282 = vrot.lane.b32.xlu1 %v2739_v4, %s2420_s27  ;;  %s2120_s27 = sshll.u32 %s2506_s17, 8 }
 0x97b   : > { %1484 = vrot.lane.b32.xlu1 %v2739_v4, %s2421_s28 }
 0x9db   : > { %v1056_v6 = vpop.xlane.xlu0 %1055 }
 0x9dc   : > { %v1060_v7 = vsub.f32 %v1046_v54, %v1056_v6 }
 0x9de   : > { %v1062_v8 = vmul.f32 1.442695, %v1060_v7 }
 0x9df   : > { %v1059_v31 = vpop.xlane.xlu1 %1058  ;;  %v1260_v9 = vpop.xlane.xlu0 %1259 }
 0x9e0   : > { %2319 = vpow2.f32 %v1062_v8  ;;  %v1061_v10 = vsub.f32 %v1051_v59, %v1059_v31  ;;  %v1264_v11 = vsub.f32 %v1250_v57, %v1260_v9 }
 0x9e2   : > { %v1064_v12 = vmul.f32 1.442695, %v1061_v10  ;;  %v1266_v14 = vmul.f32 1.442695, %v1264_v11 }
 0x9e3   : > { %v1263_v15 = vpop.xlane.xlu1 %1262  ;;  %v1462_v16 = vpop.xlane.xlu0 %1461 }
 0x9e4   : > { %2321 = vpow2.f32 %v1064_v12  ;;  %v1265_v17 = vsub.f32 %v1255_v0, %v1263_v15  ;;  %v1466_v18 = vsub.f32 %v1452_v1, %v1462_v16 }
 0x9e5   : > { %2323 = vpow2.f32 %v1266_v14 }
 0x9e6   : > { %v1268_v19 = vmul.f32 1.442695, %v1265_v17  ;;  %v1468_v20 = vmul.f32 1.442695, %v1466_v18 }
 0x9e7   : > { %v1465_v21 = vpop.xlane.xlu1 %1464  ;;  %v1083_v22 = vpop.permute.xlu0 %1082 }
 0x9e8   : > { %2325 = vpow2.f32 %v1268_v19  ;;  %v1467_v23 = vsub.f32 %v1457_v63, %v1465_v21  ;;  %2204 = vmatprep.subr.mxu0 %v1083_v22 }
 0x9e9   : > { %2327 = vpow2.f32 %v1468_v20  ;;  %2205 = vmatpush3.msra.mxu0 %v1083_v22 }
 0x9ea   : > { %v1470_v24 = vmul.f32 1.442695, %v1467_v23 }
 0x9eb   : > { %v1081_v25 = vpop.permute.xlu1 %1080  ;;  %v1487_v42 = vpop.permute.xlu0 %1486 }
 0x9ec   : > { %2329 = vpow2.f32 %v1470_v24  ;;  %2206 = vmatprep.subr.mxu0 %v1081_v25 }
 0x9ed   : > { %v2320_v26 = vpop.eup %2319  ;;  %2207 = vmatpush3.msra.mxu0 %v1081_v25 }
 0x9ee   : > { %v1066_v27 = vsel %vm611_vm2, %v2320_v26, 0.0 }
 0x9ef   : > { %v1285_v28 = vpop.permute.xlu1 %1284  ;;  %1067 = vadd.xlane.f32.xlu0 %v1066_v27 }
 0x9f0   : > { %2218 = vmatprep.subr.mxu0 %v1285_v28 }
 0x9f1   : > { %v2322_v29 = vpop.eup %2321 }
 0x9f2   : > { %v2324_v30 = vpop.eup %2323  ;;  %v1069_v32 = vsel %vm611_vm2, %v2322_v29, 0.0 }
 0x9f3   : > { %1070 = vadd.xlane.f32.xlu1 %v1069_v32  ;;  %v1270_v33 = vsel %vm611_vm2, %v2324_v30, 0.0  ;;  %v1283_v41 = vpop.permute.xlu1 %1282 }
 0x9f4   : > { %1271 = vadd.xlane.f32.xlu0 %v1270_v33 }
 0x9f5   : > { %v2326_v35 = vpop.eup %2325 }
 0x9f6   : > { %v2328_v36 = vpop.eup %2327  ;;  %v1273_v37 = vsel %vm611_vm2, %v2326_v35, 0.0 }
 0x9f7   : > { %1274 = vadd.xlane.f32.xlu1 %v1273_v37  ;;  %v1472_v38 = vsel %vm611_vm2, %v2328_v36, 0.0  ;;  %v1485_v43 = vpop.permute.xlu1 %1484 }
 0x9f8   : > { %1473 = vadd.xlane.f32.xlu0 %v1472_v38 }
 0x9f9   : > { %v2330_v39 = vpop.eup %2329 }
 0x9fa   : > { %v1475_v40 = vsel %vm611_vm2, %v2330_v39, 0.0 }
 0x9fb   : > { %1476 = vadd.xlane.f32.xlu1 %v1475_v40  ;;  %v471_v40 = vld [vmem:[%s2888_s7 + $0x18] sm:$0xff] }
 0xa0c   : > { %1575 = vrot.lane.b32.xlu1 %v2664_v46, %s2422_s29 }
 0xa0e   : > { %1577 = vrot.lane.b32.xlu0 %v2660_v44, %s2422_s29 }
 0xa10   : > { %1573 = vrot.lane.b32.xlu1 %v2676_v50, %s2423_s30 }
 0xa12   : > { %1571 = vrot.lane.b32.xlu0 %v2655_v34, %s2423_s30  ;;  %s2824_s30 = scalar_lea.hbm %s2891_s10, %s2120_s27 }
 0xa78   : > { %v1068_v45 = vpop.xlane.xlu0 %1067 }
 0xa79   : > { %2331 = vrcp.f32 %v1068_v45 }
 0xa7c   : > { %v1071_v47 = vpop.xlane.xlu1 %1070 }
 0xa7d   : > { %2333 = vrcp.f32 %v1071_v47  ;;  %v1272_v48 = vpop.xlane.xlu0 %1271 }
 0xa7e   : > { %2335 = vrcp.f32 %v1272_v48 }
 0xa80   : > { %v1275_v49 = vpop.xlane.xlu1 %1274 }
 0xa81   : > { %2337 = vrcp.f32 %v1275_v49  ;;  %v1474_v51 = vpop.xlane.xlu0 %1473 }
 0xa82   : > { %2339 = vrcp.f32 %v1474_v51 }
 0xa84   : > { %v1477_v46 = vpop.xlane.xlu1 %1476 }
 0xa85   : > { %2341 = vrcp.f32 %v1477_v46  ;;  %v1578_v60 = vpop.permute.xlu0 %1577 }
 0xa86   : > { %v2332_v44 = vpop.eup %2331 }
 0xa87   : > { %v1074_v53 = vmul.f32 %v2332_v44, %v2320_v26 }
 0xa88   : > { %v1576_v6 = vpop.permute.xlu1 %1575 }
 0xa89   : > { %2208 = vmatprep.mubr.msk.f32.mxu0 %vm611_vm2, %v1074_v53  ;;  %v1572_v63 = vpop.permute.xlu0 %1571 }
 0xa8a   : > { %v2334_v34 = vpop.eup %2333 }
 0xa8b   : > { %v2336_v50 = vpop.eup %2335  ;;  %v1075_v54 = vmul.f32 %v2334_v34, %v2322_v29 }
 0xa8c   : > { %v1278_v55 = vmul.f32 %v2336_v50, %v2324_v30  ;;  %v1574_v7 = vpop.permute.xlu1 %1573 }
 0xa8d   : > { %2209 = vmatmul.mubr.msk.f32.vlgmr.msra.gmra.mxu0 %vm611_vm2, %v1075_v54 }
 0xa8e   : > { %v2338_v56 = vpop.eup %2337  ;;  %2219 = vmatpush3.msra.mxu0 %v1285_v28  ;;  %v1280_v57 = vadd.f32 %v1278_v55, %v1074_v53  ;;  %2222 = vmatprep.mubr.msk.f32.mxu0 %vm611_vm2, %v1278_v55 }
 0xa8f   : > { %v2340_v59 = vpop.eup %2339  ;;  %2220 = vmatprep.subr.mxu0 %v1283_v41  ;;  %v1279_v61 = vmul.f32 %v2338_v56, %v2326_v35 }
 0xa90   : > { %2221 = vmatpush3.msra.mxu0 %v1283_v41  ;;  %v1480_v62 = vmul.f32 %v2340_v59, %v2328_v36  ;;  %v470_v41 = vld [vmem:[%s2888_s7 + $0x10] sm:$0xff] }
 0xa91   : > { %2232 = vmatprep.subr.mxu0 %v1487_v42  ;;  %v1281_v0 = vadd.f32 %v1279_v61, %v1075_v54  ;;  %2223 = vmatmul.mubr.msk.f32.vlgmr.msra.gmra.mxu0 %vm611_vm2, %v1279_v61 }
 0xa92   : > { %v2342_v1 = vpop.eup %2341  ;;  %2233 = vmatpush3.msra.mxu0 %v1487_v42  ;;  %v2764_v13 = vadd.f32 %v1480_v62, %v1280_v57  ;;  %2236 = vmatprep.mubr.msk.f32.mxu0 %vm611_vm2, %v1480_v62  ;;  %v469_v42 = vld [vmem:[%s2888_s7 + $0x8] sm:$0xff] }
 0xa93   : > { %2234 = vmatprep.subr.mxu0 %v1485_v43  ;;  %v1481_v2 = vmul.f32 %v2342_v1, %v2330_v39 }
 0xa94   : > { %2235 = vmatpush3.msra.mxu0 %v1485_v43  ;;  %v468_v43 = vld [vmem:[%s2888_s7] sm:$0xff] }
 0xa95   : > { %2239 = vmatprep.subr.msk.mxu0 %vm968_vm9, %v1578_v60  ;;  %v1483_v3 = vadd.f32 %v1481_v2, %v1281_v0  ;;  %2237 = vmatmul.mubr.msk.f32.vlgmr.msra.gmra.mxu0 %vm611_vm2, %v1481_v2 }
 0xa96   : > { %2240 = vmatpush3.xpose.msk.msra.mxu0 %vm968_vm9, %v1578_v60  ;;  %2243 = vmatprep.mubr.msk.f32.mxu0 %vm968_vm9, %v1572_v63 }
 0xa97   : > { %2241 = vmatprep.subr.msk.mxu0 %vm968_vm9, %v1576_v6 }
 0xa9a   : > { %2242 = vmatpush3.xpose.msk.msra.mxu0 %vm968_vm9, %v1576_v6 }
 0xa9d   : > { %2244 = vmatmul.mubr.msk.f32.vlgmr.msra.gmra.mxu0 %vm968_vm9, %v1574_v7 }
 0xb4d   : > { %v2774_v8 = vpop.f32.mrf.mxu0 }
 0xb4f   : > { %v2776_v31 = vpop.f32.mrf.mxu0 }
 0xb51   : > { %v2224_v9 = vpop.f32.mrf.mxu0 }
 0xb53   : > { %v1360_v10 = vpop.f32.mrf.mxu0 }
 0xb55   : > { %v2238_v11 = vpop.f32.mrf.mxu0 }
 0xb57   : > { %v1562_v12 = vpop.f32.mrf.mxu0 }
 0xb5d   : > { %v2245_v14 = vpop.f32.mrf.mxu0 }
 0xb5e   : > { %v1659_v15 = vadd.f32 %v2245_v14, %v2727_v58 }
 0xb5f   : > { %v1653_v16 = vpop.f32.mrf.mxu0 }
 0xb60   : > { %v1654_v17 = vadd.f32 %v1653_v16, %v2720_v52  ;;  %v1665_v18 = vsel %vm611_vm2, %v1659_v15, -inf }
 0xb61   : > { %1666 = vmax.xlane.f32.xlu1 %v1665_v18 }
 0xb62   : > { %v1662_v19 = vsel %vm611_vm2, %v1654_v17, -inf }
 0xb63   : > { %1663 = vmax.xlane.f32.xlu0 %v1662_v19 }
 0xb72   : > { %1686 = vrot.lane.b32.xlu1 %v2739_v4, %s2424_s11 }
 0xb76   : > { %1775 = vrot.lane.b32.xlu1 %v1360_v10, %s2892_s12 }
 0xb7a   : > { %1777 = vrot.lane.b32.xlu1 %v2224_v9, %s2892_s12 }
 0xb7e   : > { %1785 = vrot.lane.b32.xlu1 %v2238_v11, %s2426_s18 }
 0xbea   : > { %v1667_v58 = vpop.xlane.xlu1 %1666 }
 0xbeb   : > { %v1669_v20 = vsub.f32 %v1659_v15, %v1667_v58 }
 0xbec   : > { %v1664_v21 = vpop.xlane.xlu0 %1663 }
 0xbed   : > { %v1672_v52 = vmul.f32 1.442695, %v1669_v20  ;;  %v1668_v22 = vsub.f32 %v1654_v17, %v1664_v21 }
 0xbee   : > { %v1687_v30 = vpop.permute.xlu1 %1686 }
 0xbef   : > { %2343 = vpow2.f32 %v1672_v52  ;;  %v1670_v23 = vmul.f32 1.442695, %v1668_v22 }
 0xbf1   : > { %2345 = vpow2.f32 %v1670_v23 }
 0xbf2   : > { %v1776_v48 = vpop.permute.xlu1 %1775 }
 0xbf3   : > { %v1797_v44 = vsel %vm968_vm9, %v2776_v31, %v1776_v48 }
 0xbf6   : > { %v1778_v49 = vpop.permute.xlu1 %1777 }
 0xbf7   : > { %v1798_v34 = vsel %vm968_vm9, %v2774_v8, %v1778_v49 }
 0xbfa   : > { %v1786_v51 = vpop.permute.xlu1 %1785 }
 0xbfb   : > { %v1800_v55 = vsel %vm611_vm2, %v1798_v34, %v1786_v51 }
 0xbfc   : > { %v2344_v24 = vpop.eup %2343 }
 0xbfd   : > { %v1677_v25 = vsel %vm611_vm2, %v2344_v24, 0.0 }
 0xbfe   : > { %v2346_v26 = vpop.eup %2345  ;;  %1678 = vadd.xlane.f32.xlu0 %v1677_v25 }
 0xbff   : > { %v1674_v4 = vsel %vm611_vm2, %v2346_v26, 0.0 }
 0xc02   : > { %1675 = vadd.xlane.f32.xlu0 %v1674_v4 }
 0xc18   : > { %1688 = vrot.lane.b32.xlu0 %v2742_v5, %s2424_s11  ;;  %s1920_s11 = sshll.u32 %s2793_s26, 4  ;;  %s2827_s11 = int_to_ptr.vmem [resolvable:$true] %s1920_s11 }
 0xc19   : > { %s2351_s21 = scalar_lea.vmem %s2827_s11, 256 }
 0xc1a   : > { %p2352_p11 = scmp.ne.s32.totalorder %s2827_s11, %s2351_s21 }
 0xc1c   : > { %1783 = vrot.lane.b32.xlu0 %v1562_v12, %s2426_s18  ;;  %s2831_s18 = scalar_lea.sflag [#allocation3], %s418_s20  ;;  %p2353_p12 = pnand %p2352_p11, %p2523_p5 }
 0xc1e   : > { %p2354_p13 = pneg %p2353_p12 }
 0xc87   : > { %v1679_v27 = vpop.xlane.xlu0 %1678 }
 0xc88   : > { %2347 = vrcp.f32 %v1679_v27 }
 0xc8b   : > { %v1676_v28 = vpop.xlane.xlu0 %1675 }
 0xc8c   : > { %2349 = vrcp.f32 %v1676_v28 }
 0xc8f   : > { %v1689_v29 = vpop.permute.xlu0 %1688 }
 0xc90   : > { %2246 = vmatprep.subr.mxu1 %v1689_v29 }
 0xc91   : > { %2247 = vmatpush3.msra.mxu1 %v1689_v29 }
 0xc92   : > { %2248 = vmatprep.subr.mxu1 %v1687_v30 }
 0xc93   : > { %2249 = vmatpush3.msra.mxu1 %v1687_v30  ;;  %v1784_v46 = vpop.permute.xlu0 %1783 }
 0xc94   : > { %2253 = vmatprep.subr.mxu1 %v471_v40  ;;  %v1799_v50 = vsel %vm611_vm2, %v1797_v44, %v1784_v46 }
 0xc95   : > { %v2348_v32 = vpop.eup %2347 }
 0xc96   : > { %v1683_v33 = vmul.f32 %v2348_v32, %v2344_v24 }
 0xc98   : > { %v1685_v35 = vadd.f32 %v1683_v33, %v1483_v3 }
 0xc99   : > { %v2350_v36 = vpop.eup %2349 }
 0xc9a   : > { %v1682_v37 = vmul.f32 %v2350_v36, %v2346_v26  ;;  %v1894_v5 = vmul.f32 0.25, %v1685_v35 }
 0xc9c   : > { %v1684_v38 = vadd.f32 %v1682_v37, %v2764_v13  ;;  %2250 = vmatprep.mubr.msk.f32.mxu1 %vm611_vm2, %v1682_v37  ;;  %1896 = vst.msk [vmem:[%s2793_s26 + $0x8] sm:$0xff] %vm611_vm2, %v1894_v5 }
 0xc9d   : > { %2251 = vmatmul.mubr.msk.f32.vlgmr.msra.gmra.mxu1 %vm611_vm2, %v1683_v33 }
 0xc9e   : > { %v1893_v39 = vmul.f32 0.25, %v1684_v38  ;;  %2254 = vmatpush3.msra.mxu1 %v471_v40 }
 0xc9f   : > { %2255 = vmatprep.subr.mxu1 %v470_v41 }
 0xca0   : > { %1895 = vst.msk [vmem:[%s2793_s26] sm:$0xff] %vm611_vm2, %v1893_v39  ;;  %2256 = vmatpush3.msra.mxu1 %v470_v41 }
 0xca1   : > { %2257 = vmatprep.subr.mxu1 %v469_v42 }
 0xca2   : > { %2258 = vmatpush3.msra.mxu1 %v469_v42 }
 0xca3   : > { %2259 = vmatprep.subr.mxu1 %v468_v43 }
 0xca4   : > { %2260 = vmatpush3.msra.mxu1 %v468_v43 }
 0xd5d   : > { %v2252_v45 = vpop.f32.mrf.mxu1 }
 0xd5e   : > { %1793 = vrot.lane.b32.xlu1 %v2252_v45, %s2427_s25 }
 0xd5f   : > { %v1764_v47 = vpop.f32.mrf.mxu1 }
 0xd60   : > { %1791 = vrot.lane.b32.xlu0 %v1764_v47, %s2427_s25  ;;  %s2428_s25 = smov [#allocation2]  }
 0xd61   : > { %s2355_s12 = sshll.u32 %s2428_s25, 4  ;;  %s2356_s12 = int_to_ptr.vmem [resolvable:$false] %s2355_s12 }
 0xd62   : > { %s2357_s28 = scalar_lea.vmem %s2356_s12, 512  ;;  %p2358_p0 = scmp.lt.s32.totalorder %s2827_s11, %s2356_s12 }
 0xd63   : > { %p2359_p1 = scmp.lt.s32.totalorder %s2357_s28, %s2351_s21 }
 0xd65   : > { %p2360_p2 = por %p2359_p1, %p2358_p0 }
 0xd67   : > { %p2361_p3 = pnand %p2360_p2, %p2354_p13 }
 0xdd0   : > { %v1794_v53 = vpop.permute.xlu1 %1793 }
 0xdd1   : > { %v1803_v57 = vsel %vm1801_vm6, %v1800_v55, %v1794_v53 }
 0xdd2   : > { %v1792_v54 = vpop.permute.xlu0 %1791 }
 0xdd3   : > { %v1802_v56 = vsel %vm1801_vm6, %v1799_v50, %v1792_v54 }
 0xdd4   : > { %2261 = vmatprep.mubr.msk.f32.mxu1 %vm846_vm4, %v1802_v56 }
 0xdd5   : > { %2262 = vmatmul.mubr.msk.f32.vlgmr.msra.gmra.mxu1 %vm846_vm4, %v1803_v57 }
 0xdd6   : > { %2364 = shalt.err (!%p2361_p3)
}
 0xdd7   : > { %s2365_s20 = scalar_lea.hbm %s2824_s30, 256  ;;  %s2369_s29 = scalar_lea.hbm %s2891_s10, 512 }
 0xdd8   : > { %p2366_p4 = scmp.ne.s32.totalorder %s2824_s30, %s2365_s20  ;;  %p2370_p9 = scmp.lt.s32.totalorder %s2824_s30, %s2891_s10 }
 0xdd9   : > { %p2371_p10 = scmp.lt.s32.totalorder %s2369_s29, %s2365_s20 }
 0xdda   : > { %p2367_p7 = pnand %p2366_p4, %p2523_p5 }
 0xddb   : > { %p2372_p11 = por %p2371_p10, %p2370_p9 }
 0xddc   : > { %p2368_p8 = pneg %p2367_p7 }
 0xdde   : > { %p2373_p12 = pnand %p2372_p11, %p2368_p8 }
 0xde0   : > { %2376 = shalt.err (!%p2373_p12)
}
 0xde1   : > { %s2429_s12 = smov 128   ;;  %s2897_s21 = smov 8   ;;  %v2107_v60 = vld [vmem:[%s2889_s8] ss:$0 sm:$0xff] }
 0xde2   : > { %2264 = dma.vmem_to_hbm [thread:$0]  (%p2523_p5), %s2827_s11, 256, %s2824_s30, %s2831_s18, %s2429_s12, %s2429_s12, %s2897_s21  }
 0xde3   : > { %s2070_s28 = sshll.u32 %s2506_s17, 1 }
 0xde4   : > { %p447_p13 = scmp.lt.s32.totalorder %s2070_s28, 3 }
 0xde6   : > { %s2903_s28 = smov (!%p447_p13, %s2070_s28), 3 }
 0xde7   : > { %s2071_s26 = sshll.u32 %s2903_s28, 3 }
 0xde8   : > { %s450_s25 = scalar_lea.vmem %s2890_s9, %s2071_s26 }
 0xe95   : > { %v2263_v59 = vpop.f32.mrf.mxu1 }
 0xe96   : > { %v1888_v0 = vadd.f32 %v2263_v59, %v2107_v60 }
 0xe97   : > { %v1882_v61 = vpop.f32.mrf.mxu1 }
 0xe98   : > { %v1883_v62 = vadd.f32 %v2107_v60, %v1882_v61  ;;  %1892 = vst.msk [vmem:[%s450_s25 + $0x8] sm:$0xff] %vm846_vm4, %v1888_v0 }
 0xe9a   : > { %1891 = vst.msk [vmem:[%s450_s25] sm:$0xff] %vm846_vm4, %v1883_v62 }
 0xe9b PF: > { %p2270_p5 = scmp.ge.s32.totalorder %s2411_s16, 2  ;;  %s1943_s17 = sand.u32 1, %s2399_s13  }
 0xe9c   : > { %s1944_s23 = scalar_lea.sflag [#allocation3], %s1943_s17 }
 0xe9d   : > { %p2267_p0 = pnand %p2270_p5, %p2527_p6 }
 0xe9f   : > { %p2268_p1 = pneg %p2267_p0 }
 0xea1   : > { %2394 = dma.done.wait (%p2268_p1), %s1944_s23, 256  }
 0xea2   : > { %2396 = vsyncadd (%p2268_p1), %s1944_s23, 4294967040  ;;  %p21_p2 = scmp.ge.s32.totalorder %s2510_s19, 4   ;;  %s2898_s13 = smov %s2403_s14 }
 0xea3   : > { %s2899_s14 = smov %s2407_s15  ;;  %s2900_s15 = smov %s2521_s22 }
 0xea4   : > { %s2901_s16 = smov %s2510_s19  ;;  %23 = sbr.rel (!%p21_p2) target bundleno = 5 (0x5), region = 115 }
 0xea9   :  { %1949 = vsyncpa [#allocation3], 1 }
 0xeaa   :  { %1951 = vsyncpa [#allocation3 + $0x1], 1 }

</bundles_post_ra>
